<compile_context>
chip_gen: v5e
topology: v5e:2x2
jax: 0.10.0
libtpu: 0.0.40
codegen_flags: <defaults>
</compile_context>

<pallas_src>
import jax
import jax.numpy as jnp
from jax.experimental import pallas as pl
from jax.experimental.pallas import tpu as pltpu


_TARGET_BLOCK_BYTES = 4 * 1024 * 1024   # ~4 MiB per block (HBM-bound add)
_VMEM_LIMIT_BYTES = 32 * 1024 * 1024    # 2x(x)+2x(out) @ 4 MiB ~= 16 MiB + slack
_FAST_PATH_BYTES = 1 << 20              # below ~1 MiB, plain XLA add wins


# ---------------- kernel ----------------

def _add_bias_kernel(x_ref, b_ref, o_ref):
    # x_ref: (tile_n, tile_c); b_ref: (1, tile_c) row bias OR (tile_n, 1)
    # column bias.  Either way: one broadcasted VPU add, kernel is DMA-bound.
    o_ref[...] = x_ref[...] + b_ref[...]


# ---------------- tiling helper ----------------

def _pick_tiles(n_rows, n_cols, itemsize, target_bytes=_TARGET_BLOCK_BYTES):
    """Pick a (tile_n, tile_c) block of ~target_bytes that is TPU-layout clean.

    tile_c is the full column extent or a multiple of 128 (>=512 lanes so the
    redundant bias fetch / per-block DMA overhead stays tiny); tile_n is the
    full row extent or a multiple of the dtype's minimum sublane tile
    (8 for 4-byte, 16 for 2-byte, 32 for 1-byte elements).
    """
    sub = max(8, 32 // itemsize)          # dtype-aware sublane multiple

    # Lane (column) tile.
    cap_c = max(512, (target_bytes // (128 * itemsize)) // 128 * 128)
    tile_c = n_cols if n_cols <= cap_c else cap_c

    # Sublane (row) tile: as tall as the byte budget allows.
    rows = max(sub, target_bytes // (tile_c * itemsize))
    tile_n = n_rows if rows >= n_rows else max(sub, (rows // sub) * sub)

    # v7x megacore: guarantee >=2 grid steps so both TensorCores stream
    # (harmless on single-TC v5e/v6e: one extra cheap step).
    if tile_n >= n_rows and tile_c >= n_cols:
        if n_rows >= 2 * sub:
            tile_n = max(sub, (n_rows // 2) // sub * sub)
        elif n_cols >= 256:
            tile_c = max(128, (n_cols // 2) // 128 * 128)

    return int(tile_n), int(tile_c)


# ---------------- pallas wrappers ----------------

def _add_bias_rows(x2d, bias_row):
    """x2d: (N, C); bias_row: (1, C) in x2d.dtype. Returns x2d + bias_row."""
    n, c = x2d.shape
    tile_n, tile_c = _pick_tiles(n, c, x2d.dtype.itemsize)
    # Column axis OUTER, row axis INNER: the bias block index (0, j) is
    # constant across the inner axis, so its DMA is elided on consecutive
    # steps (no per-step bias re-fetch).
    grid = (pl.cdiv(c, tile_c), pl.cdiv(n, tile_n))
    return pl.pallas_call(
        _add_bias_kernel,
        out_shape=jax.ShapeDtypeStruct((n, c), x2d.dtype),
        grid=grid,
        in_specs=[
            pl.BlockSpec((tile_n, tile_c), lambda j, i: (i, j)),
            pl.BlockSpec((1, tile_c), lambda j, i: (0, j)),
        ],
        out_specs=pl.BlockSpec((tile_n, tile_c), lambda j, i: (i, j)),
        compiler_params=pltpu.CompilerParams(
            dimension_semantics=("parallel", "parallel"),
            vmem_limit_bytes=_VMEM_LIMIT_BYTES),
    )(x2d, bias_row)


def _add_bias_cols(x2d, bias_col):
    """x2d: (R, C); bias_col: (R, 1) in x2d.dtype. Returns x2d + bias_col."""
    n, c = x2d.shape
    tile_n, tile_c = _pick_tiles(n, c, x2d.dtype.itemsize)
    # Row axis OUTER, column axis INNER: bias block index (i, 0) is constant
    # across the inner axis (and the bias tile is only tile_n elements anyway).
    grid = (pl.cdiv(n, tile_n), pl.cdiv(c, tile_c))
    return pl.pallas_call(
        _add_bias_kernel,
        out_shape=jax.ShapeDtypeStruct((n, c), x2d.dtype),
        grid=grid,
        in_specs=[
            pl.BlockSpec((tile_n, tile_c), lambda i, j: (i, j)),
            pl.BlockSpec((tile_n, 1), lambda i, j: (i, 0)),
        ],
        out_specs=pl.BlockSpec((tile_n, tile_c), lambda i, j: (i, j)),
        compiler_params=pltpu.CompilerParams(
            dimension_semantics=("parallel", "parallel"),
            vmem_limit_bytes=_VMEM_LIMIT_BYTES),
    )(x2d, bias_col)


# ---------------- module ----------------

class AddBias:
    """JAX/Pallas port of the PyTorch AddBias module."""

    def __init__(self, bias):
        # PyTorch stores nn.Parameter(bias.unsqueeze(1)) -> (C, 1); we keep the
        # flat (C,) vector (equivalent of ._bias.t().view(1, -1) on use).
        self._bias = jnp.asarray(bias).reshape(-1)

    def __call__(self, x):
        c = self._bias.shape[0]
        nbytes = x.size * x.dtype.itemsize

        if x.ndim == 2:
            bias_row = self._bias.astype(x.dtype).reshape(1, c)
            # Fast path: tiny inputs / <128 columns -> pallas dispatch overhead
            # and masked sub-128-lane stores dominate; fused XLA add is faster.
            if nbytes < _FAST_PATH_BYTES or x.shape[1] < 128:
                return x + bias_row
            return _add_bias_rows(x, bias_row)

        elif x.ndim == 4:
            n, ch, h, w = x.shape
            bias = self._bias.astype(x.dtype)
            if nbytes < _FAST_PATH_BYTES:
                return x + bias[None, :, None, None]
            hw = h * w
            if hw % 128 == 0:
                # Lowest-traffic formulation: rows are (n, c) pairs, columns
                # are the lane-dense spatial axis; bias is a tiny (N*C, 1)
                # column -> no C*H*W bias duplication in HBM.
                x2 = x.reshape(n * ch, hw)
                bias_col = jnp.broadcast_to(bias[None, :], (n, ch)).reshape(n * ch, 1)
                return _add_bias_cols(x2, bias_col).reshape(n, ch, h, w)
            else:
                # Fallback: flatten to (N, C*H*W); column c*H*W + s carries
                # bias[c], so one row-broadcast add reproduces the NCHW add.
                x2 = x.reshape(n, ch * hw)
                bias_row = jnp.broadcast_to(bias[:, None], (ch, hw)).reshape(1, ch * hw)
                return _add_bias_rows(x2, bias_row).reshape(n, ch, h, w)

        else:
            raise ValueError(f"AddBias expects 2-D or 4-D input, got {x.ndim}-D")


# ---------------- demo / check ----------------

if __name__ == "__main__":
    key = jax.random.PRNGKey(0)
    keys = jax.random.split(key, 10)

    # --- 1) 2-D module-sized case (fast path): x (2, 32), bias (32,) ---
    bias2 = jax.random.normal(keys[0], (32,), dtype=jnp.float32)
    x2 = jax.random.normal(keys[1], (2, 32), dtype=jnp.float32)
    y2 = jax.block_until_ready(AddBias(bias2)(x2))
    assert y2.shape == x2.shape and y2.dtype == x2.dtype
    assert jnp.allclose(y2, x2 + bias2[None, :], atol=1e-6), "2-D small mismatch"

    # --- 2) 4-D module-sized case (fast path): x (2, 4, 16, 16), bias (4,) ---
    bias4 = jax.random.normal(keys[2], (4,), dtype=jnp.float32)
    x4 = jax.random.normal(keys[3], (2, 4, 16, 16), dtype=jnp.float32)
    y4 = jax.block_until_ready(AddBias(bias4)(x4))
    assert y4.shape == x4.shape and y4.dtype == x4.dtype
    assert jnp.allclose(y4, x4 + bias4[None, :, None, None], atol=1e-6), "4-D small mismatch"

    # --- 3) 2-D Pallas path (row-broadcast kernel): x (512, 1024) f32 ---
    bias_p2 = jax.random.normal(keys[4], (1024,), dtype=jnp.float32)
    x_p2 = jax.random.normal(keys[5], (512, 1024), dtype=jnp.float32)
    y_p2 = jax.block_until_ready(AddBias(bias_p2)(x_p2))
    assert jnp.allclose(y_p2, x_p2 + bias_p2[None, :], atol=1e-6), "2-D pallas mismatch"

    # --- 4) 4-D Pallas path, H*W % 128 == 0 (column-bias kernel): (8,32,32,32) ---
    bias_p4 = jax.random.normal(keys[6], (32,), dtype=jnp.float32)
    x_p4 = jax.random.normal(keys[7], (8, 32, 32, 32), dtype=jnp.float32)
    y_p4 = jax.block_until_ready(AddBias(bias_p4)(x_p4))
    assert jnp.allclose(y_p4, x_p4 + bias_p4[None, :, None, None], atol=1e-6), \
        "4-D pallas (column-bias) mismatch"

    # --- 5) 4-D Pallas fallback, H*W not a multiple of 128: (8, 64, 24, 24) ---
    bias_p4b = jax.random.normal(keys[8], (64,), dtype=jnp.float32)
    x_p4b = jax.random.normal(keys[9], (8, 64, 24, 24), dtype=jnp.float32)
    y_p4b = jax.block_until_ready(AddBias(bias_p4b)(x_p4b))
    assert jnp.allclose(y_p4b, x_p4b + bias_p4b[None, :, None, None], atol=1e-6), \
        "4-D pallas (row-bias fallback) mismatch"

    # --- 6) bf16 Pallas path (exercises the 16-sublane dtype tiling) ---
    x_bf = jax.random.normal(keys[5], (1024, 2048), dtype=jnp.float32).astype(jnp.bfloat16)
    bias_bf = jax.random.normal(keys[4], (2048,), dtype=jnp.float32)
    y_bf = jax.block_until_ready(AddBias(bias_bf)(x_bf))
    ref_bf = x_bf + bias_bf.astype(jnp.bfloat16)[None, :]
    assert y_bf.dtype == jnp.bfloat16
    assert jnp.allclose(y_bf.astype(jnp.float32), ref_bf.astype(jnp.float32), atol=1e-2), \
        "bf16 pallas mismatch"

    print("KERNEL_OK")
</pallas_src>

<mosaic_0001>
module attributes {stable_mosaic.version = 11 : i64} {
  func.func @_add_bias_kernel(%arg0: i32, %arg1: i32, %arg2: memref<256x1024xf32, #tpu.memory_space<vmem>>, %arg3: memref<1x1024xf32, #tpu.memory_space<vmem>>, %arg4: memref<256x1024xf32, #tpu.memory_space<vmem>>) attributes {dimension_semantics = [#tpu.dimension_semantics<parallel>, #tpu.dimension_semantics<parallel>], iteration_bounds = array<i64: 1, 2>, scalar_prefetch = 0 : i64, scratch_operands = 0 : i64, tpu.core_type = #tpu.core_type<tc>, window_params = [{transform_indices = @transform_0, window_bounds = array<i64: 256, 1024>}, {transform_indices = @transform_1, window_bounds = array<i64: 1, 1024>}, {transform_indices = @transform_2, window_bounds = array<i64: 256, 1024>}]} {
    %c0 = arith.constant 0 : index
    %c0_0 = arith.constant 0 : index
    %0 = vector.load %arg2[%c0, %c0_0] : memref<256x1024xf32, #tpu.memory_space<vmem>>, vector<256x1024xf32>
    %c0_1 = arith.constant 0 : index
    %c0_2 = arith.constant 0 : index
    %1 = vector.load %arg3[%c0_1, %c0_2] : memref<1x1024xf32, #tpu.memory_space<vmem>>, vector<1x1024xf32>
    %2 = vector.broadcast %1 : vector<1x1024xf32> to vector<256x1024xf32>
    %3 = arith.addf %0, %2 : vector<256x1024xf32>
    %c0_3 = arith.constant 0 : index
    %c0_4 = arith.constant 0 : index
    %4 = vector.load %arg4[%c0_3, %c0_4] : memref<256x1024xf32, #tpu.memory_space<vmem>>, vector<256x1024xf32>
    tpu.vector_store %arg4[%c0_3, %c0_4], %3 {strides = array<i32>} : memref<256x1024xf32, #tpu.memory_space<vmem>>, vector<256x1024xf32>,
    return
  }
  func.func @transform_0(%arg0: i32, %arg1: i32) -> (i32, i32) {
    %c0_i32 = arith.constant 0 : i32
    return %arg1, %arg0 : i32, i32
  }
  func.func @transform_1(%arg0: i32, %arg1: i32) -> (i32, i32) {
    %c0_i32 = arith.constant 0 : i32
    %c0_i32_0 = arith.constant 0 : i32
    return %c0_i32, %arg0 : i32, i32
  }
  func.func @transform_2(%arg0: i32, %arg1: i32) -> (i32, i32) {
    %c0_i32 = arith.constant 0 : i32
    return %arg1, %arg0 : i32, i32
  }
}

</mosaic_0001>

<bundles_post_ra>
// kernel: tpu_custom_call.1
= control target key start
LH: loop header
LB: loop body
LE: loop exit
PB: predicated region body
PF: predicated region fallthrough
CT: control target
= control target key end

     0   :  { %7 = vsyncpa [#allocation3], 0  ;;  %s2322_s0 = inlined_call_operand.hbm [shape: f32[512,1024], index: 0, kind: input, shape index: {}]   ;;  %s2323_s1 = inlined_call_operand.hbm [shape: f32[1,1024], index: 1, kind: input, shape index: {}]   ;;  %s2324_s2 = inlined_call_operand.hbm [shape: f32[512,1024], index: 2, kind: output, shape index: {}]  }
   0x1   :  { %9 = vsyncpa [#allocation3 + $0x1], 0 }
   0x2   :  { %10 = vsyncpa [#allocation6], 0 }
   0x3   :  { %11 = vsyncpa [#allocation4], 0 }
   0x4   :  { %13 = vsyncpa [#allocation4 + $0x1], 0  ;;  %s1382_s9 = smov 0   ;;  %s1384_s10 = smov 0  }
   0x5   :  { %s1386_s11 = smov 0   ;;  %s1388_s12 = smov 0  }
   0x6   :  { %s1390_s13 = smov 0   ;;  %s1392_s14 = smov 0  }
   0x7 LB: > { %s1114_s15 = sadd.s32 4294967295, %s1360_s14   ;;  %s1115_s16 = sadd.s32 4294967294, %s1360_s14   ;;  %s1360_s14 = sphi %s1392_s14, %s19_s14   ;;  %s1356_s13 = sphi %s1390_s13, %s2336_s13   ;;  %s1352_s12 = sphi %s1388_s12, %s2335_s12   ;;  %s1348_s11 = sphi %s1386_s11, %s2334_s11   ;;  %s1344_s10 = sphi %s1384_s10, %s2333_s10   ;;  %s1340_s9 = sphi %s1382_s9, %s2332_s9  }
   0x8   : > { %s40_s17 = sadd.s32 1, %s1348_s11  ;;  %p47_p0 = scmp.ne.s32.totalorder %s1348_s11, %s1344_s10 }
   0x9   : > { %p48_p1 = scmp.eq.s32.totalorder %s1360_s14, 0  ;;  %p53_p2 = scmp.ne.s32.totalorder %s1344_s10, %s1340_s9 }
   0xa   : > { %p1420_p3 = scmp.eq.s32.totalorder %s1114_s15, 0  ;;  %p105_p4 = scmp.eq.s32.totalorder %s1114_s15, 1 }
   0xb   : > { %p1424_p5 = por %p48_p1, %p47_p0  ;;  %p111_p6 = scmp.eq.s32.totalorder %s1115_s16, 1 }
   0xc   : > { %p1430_p7 = por %p1420_p3, %p53_p2  ;;  %p1434_p8 = por %p105_p4, %p47_p0 }
   0xd   : > { %p1438_p9 = por %p111_p6, %p53_p2  ;;  %p1116_p10 = scmp.ge.s32.totalorder %s1360_s14, 1 }
   0xe   : > { %p118_p11 = scmp.lt.s32.totalorder %s1360_s14, 3  ;;  %s132_s25 = sshll.u32 %s2323_s1, 4  ;;  %s133_s25 = int_to_ptr.hbm [resolvable:$true] %s132_s25 }
   0xf   : > { %s1362_s27 = smov [#allocation5]   ;;  %p1118_p13 = scmp.ge.s32.totalorder %s1360_s14, 2 }
  0x10   : > { %p1447_p12 = pnand %p1116_p10, %p118_p11  ;;  %s134_s28 = sshll.u32 %s1362_s27, 4  ;;  %s135_s28 = int_to_ptr.vmem [resolvable:$true] %s134_s28 }
  0x11   : > { %p1158_p1 = scmp.lt.s32.totalorder %s1360_s14, 2  ;;  %s28_s30 = sadd.s32 1, %s1356_s13 }
  0x12   : > { %p1145_p0 = pneg %p1447_p12  ;;  %p29_p6 = scmp.ge.s32.totalorder %s28_s30, 2 }
  0x13   : > { %p1459_p4 = pnand %p1158_p1, %p1424_p5  ;;  %s145_s3 = sand.u32 1, %s1348_s11  }
  0x14   : > { %p1146_p2 = pnand %p1145_p0, %p1420_p3  ;;  %s2338_s30 = smov (%p29_p6, %s28_s30), 0 }
  0x15   : > { %s1119_s4 = sshll.u32 %s145_s3, 11  ;;  %s35_s5 = ssub.s32 %s1356_s13, %s2338_s30 }
  0x16   : > { %1148 = dma.hbm_to_vmem [thread:$0]  (!%p1146_p2), %s133_s25, 128, %s135_s28, [#allocation6]  }
  0x17   : > { %p38_p10 = scmp.eq.s32.totalorder %s35_s5, 0  ;;  %s1134_s6 = sshll.u32 %s1356_s13, 11 }
  0x18   : > { %s157_s15 = scalar_lea.hbm %s2322_s0, %s1134_s6  ;;  %s149_s16 = scalar_lea.vmem [#allocation2], %s1119_s4 }
  0x19   : > { %s160_s19 = sshll.u32 %s149_s16, 4  ;;  %s158_s24 = sshll.u32 %s157_s15, 4  ;;  %s161_s19 = int_to_ptr.vmem [resolvable:$true] %s160_s19  ;;  %s159_s24 = int_to_ptr.hbm [resolvable:$true] %s158_s24 }
  0x1a   : > { %s1476_s23 = scalar_select %p38_p10, %s1348_s11, %s40_s17  }
  0x1b   : > { %s146_s25 = scalar_lea.sflag [#allocation3], %s145_s3  ;;  %s1363_s27 = smov 1024  }
  0x1c   : > { %s1364_s28 = smov 64   ;;  %172 = sbr.rel (%p1447_p12) target bundleno = 301 (0x12d), region = 28 }
  0x1d   : > { %1152 = dma.hbm_to_vmem [thread:$0]  (!%p1459_p4), %s159_s24, 32768, %s161_s19, %s146_s25, %s1363_s27, %s1363_s27, %s1364_s28  }
  0x1e   : > { %s1483_s5 = sand.u32 (!%p1447_p12), 1, %s1344_s10  }
  0x1f   : > { %s1124_s4 = sshll.u32 (!%p1447_p12), %s1483_s5, 11  ;;  %s175_s17 = scalar_lea.sflag (!%p1447_p12), [#allocation3], %s1483_s5 }
  0x20   : > { %s1487_s6 = scalar_lea.vmem (!%p1447_p12), [#allocation2], %s1124_s4 }
  0x21   : > { %1327 = dma.done.wait (%p1430_p7), %s175_s17, 32768  }
  0x22   : > { %1329 = vsyncadd (%p1430_p7), %s175_s17, 4294934528 }
  0x23   : > { %1331 = dma.done.wait (%p1420_p3), [#allocation6], 128  }
  0x24   : > { %1333 = vsyncadd (%p1420_p3), [#allocation6], 4294967168  ;;  %v210_v0 = vld [vmem:[%s1487_s6] sm:$0xff]  ;;  %v211_v2 = vld [vmem:[%s1487_s6 + $0x8] sm:$0xff]  ;;  %s1524_s18 = scalar_lea.vmem [#allocation7], %s1124_s4  ;;  %s1136_s20 = sshll.u32 %s1352_s12, 11 }
  0x25   : > { %v466_v1 = vld [vmem:[#allocation5] sm:$0xff]  ;;  %v212_v5 = vld [vmem:[%s1487_s6 + $0x10] sm:$0xff]  ;;  %v213_v7 = vld [vmem:[%s1487_s6 + $0x18] sm:$0xff]  ;;  %s1011_s12 = scalar_lea.hbm %s2324_s2, %s1136_s20  ;;  %s1012_s3 = sshll.u32 %s1524_s18, 4  ;;  %s1013_s3 = int_to_ptr.vmem [resolvable:$true] %s1012_s3 }
  0x26   : > { %v1499_v3 = vperm.slane %v466_v1, 0  ;;  %v1501_v4 = vperm.slane %v466_v1, 1  ;;  %v1504_v6 = vperm.slane %v466_v1, 2  ;;  %v1507_v8 = vperm.slane %v466_v1, 3  ;;  %v214_v9 = vld [vmem:[%s1487_s6 + $0x20] sm:$0xff]  ;;  %v215_v15 = vld [vmem:[%s1487_s6 + $0x28] sm:$0xff] }
  0x27   : > { %v1510_v10 = vperm.slane %v466_v1, 4  ;;  %v1512_v11 = vperm.slane %v466_v1, 5  ;;  %v1518_v16 = vperm.slane %v466_v1, 6  ;;  %v216_v18 = vld [vmem:[%s1487_s6 + $0x30] sm:$0xff]  ;;  %v1522_v19 = vperm.slane %v466_v1, 7  ;;  %v217_v21 = vld [vmem:[%s1487_s6 + $0x38] sm:$0xff] }
  0x28   : > { %v484_v12 = vadd.f32 %v1499_v3, %v210_v0  ;;  %v485_v13 = vadd.f32 %v1501_v4, %v211_v2  ;;  %v486_v14 = vadd.f32 %v1504_v6, %v212_v5  ;;  %v487_v17 = vadd.f32 %v1507_v8, %v213_v7  ;;  %v218_v23 = vld [vmem:[%s1487_s6 + $0x40] sm:$0xff]  ;;  %v219_v25 = vld [vmem:[%s1487_s6 + $0x48] sm:$0xff]  ;;  %v220_v27 = vld [vmem:[%s1487_s6 + $0x50] sm:$0xff]  ;;  %s1014_s7 = sshll.u32 %s1011_s12, 4  ;;  %s997_s8 = scalar_lea.sflag [#allocation4], %s1483_s5  ;;  %s1015_s7 = int_to_ptr.hbm [resolvable:$true] %s1014_s7 }
  0x29   : > { %v488_v20 = vadd.f32 %v1510_v10, %v214_v9  ;;  %v489_v22 = vadd.f32 %v1512_v11, %v215_v15  ;;  %v490_v24 = vadd.f32 %v1518_v16, %v216_v18  ;;  %v491_v26 = vadd.f32 %v1522_v19, %v217_v21  ;;  %v221_v29 = vld [vmem:[%s1487_s6 + $0x58] sm:$0xff]  ;;  %v222_v31 = vld [vmem:[%s1487_s6 + $0x60] sm:$0xff]  ;;  %v223_v33 = vld [vmem:[%s1487_s6 + $0x68] sm:$0xff]  ;;  %s1288_s15 = sshra.s32 %s1015_s7, 4  ;;  %s1294_s25 = scalar_lea.hbm %s2324_s2, 4096  ;;  %s1289_s15 = int_to_ptr.hbm [resolvable:$true] %s1288_s15 }
  0x2a   : > { %740 = vst [vmem:[%s1524_s18] sm:$0xff] %v484_v12  ;;  %v492_v28 = vadd.f32 %v1499_v3, %v218_v23  ;;  %v493_v30 = vadd.f32 %v1501_v4, %v219_v25  ;;  %v494_v32 = vadd.f32 %v1504_v6, %v220_v27  ;;  %v495_v34 = vadd.f32 %v1507_v8, %v221_v29  ;;  %v224_v35 = vld [vmem:[%s1487_s6 + $0x70] sm:$0xff]  ;;  %v225_v37 = vld [vmem:[%s1487_s6 + $0x78] sm:$0xff]  ;;  %v226_v39 = vld [vmem:[%s1487_s6 + $0x80] sm:$0xff]  ;;  %s1290_s16 = scalar_lea.hbm %s1289_s15, 2048  ;;  %p1295_p11 = scmp.lt.s32.totalorder %s1289_s15, %s2324_s2 }
  0x2b   : > { %741 = vst [vmem:[%s1524_s18 + $0x8] sm:$0xff] %v485_v13  ;;  %v496_v36 = vadd.f32 %v1510_v10, %v222_v31  ;;  %v497_v38 = vadd.f32 %v1512_v11, %v223_v33  ;;  %v498_v40 = vadd.f32 %v1518_v16, %v224_v35  ;;  %v227_v41 = vld [vmem:[%s1487_s6 + $0x88] sm:$0xff]  ;;  %v499_v42 = vadd.f32 %v1522_v19, %v225_v37  ;;  %v228_v43 = vld [vmem:[%s1487_s6 + $0x90] sm:$0xff]  ;;  %v229_v45 = vld [vmem:[%s1487_s6 + $0x98] sm:$0xff]  ;;  %p1291_p3 = scmp.ne.s32.totalorder %s1289_s15, %s1290_s16  ;;  %p1296_p12 = scmp.lt.s32.totalorder %s1294_s25, %s1290_s16 }
  0x2c   : > { %742 = vst [vmem:[%s1524_s18 + $0x10] sm:$0xff] %v486_v14  ;;  %v500_v44 = vadd.f32 %v1499_v3, %v226_v39  ;;  %v501_v46 = vadd.f32 %v1501_v4, %v227_v41  ;;  %v230_v47 = vld [vmem:[%s1487_s6 + $0xa0] sm:$0xff]  ;;  %v502_v48 = vadd.f32 %v1504_v6, %v228_v43  ;;  %v231_v49 = vld [vmem:[%s1487_s6 + $0xa8] sm:$0xff]  ;;  %v503_v50 = vadd.f32 %v1507_v8, %v229_v45  ;;  %v232_v51 = vld [vmem:[%s1487_s6 + $0xb0] sm:$0xff] }
  0x2d   : > { %743 = vst [vmem:[%s1524_s18 + $0x18] sm:$0xff] %v487_v17  ;;  %v504_v52 = vadd.f32 %v1510_v10, %v230_v47  ;;  %v233_v53 = vld [vmem:[%s1487_s6 + $0xb8] sm:$0xff]  ;;  %v505_v54 = vadd.f32 %v1512_v11, %v231_v49  ;;  %v234_v55 = vld [vmem:[%s1487_s6 + $0xc0] sm:$0xff]  ;;  %v506_v56 = vadd.f32 %v1518_v16, %v232_v51  ;;  %v235_v57 = vld [vmem:[%s1487_s6 + $0xc8] sm:$0xff]  ;;  %p1292_p5 = pnand %p1291_p3, %p1434_p8  ;;  %p1297_p0 = por %p1296_p12, %p1295_p11 }
  0x2e   : > { %744 = vst [vmem:[%s1524_s18 + $0x20] sm:$0xff] %v488_v20  ;;  %v507_v58 = vadd.f32 %v1522_v19, %v233_v53  ;;  %v236_v59 = vld [vmem:[%s1487_s6 + $0xd0] sm:$0xff]  ;;  %v508_v60 = vadd.f32 %v1499_v3, %v234_v55  ;;  %v237_v61 = vld [vmem:[%s1487_s6 + $0xd8] sm:$0xff]  ;;  %v509_v62 = vadd.f32 %v1501_v4, %v235_v57  ;;  %v238_v63 = vld [vmem:[%s1487_s6 + $0xe0] sm:$0xff] }
  0x2f   : > { %745 = vst [vmem:[%s1524_s18 + $0x28] sm:$0xff] %v489_v22  ;;  %v510_v0 = vadd.f32 %v1504_v6, %v236_v59  ;;  %v239_v1 = vld [vmem:[%s1487_s6 + $0xe8] sm:$0xff]  ;;  %v511_v2 = vadd.f32 %v1507_v8, %v237_v61  ;;  %v240_v5 = vld [vmem:[%s1487_s6 + $0xf0] sm:$0xff]  ;;  %v512_v7 = vadd.f32 %v1510_v10, %v238_v63  ;;  %v241_v9 = vld [vmem:[%s1487_s6 + $0xf8] sm:$0xff]  ;;  %p1293_p7 = pneg %p1292_p5 }
  0x30   : > { %746 = vst [vmem:[%s1524_s18 + $0x30] sm:$0xff] %v490_v24  ;;  %v513_v12 = vadd.f32 %v1512_v11, %v239_v1  ;;  %v242_v13 = vld [vmem:[%s1487_s6 + $0x100] sm:$0xff]  ;;  %v514_v14 = vadd.f32 %v1518_v16, %v240_v5  ;;  %v243_v15 = vld [vmem:[%s1487_s6 + $0x108] sm:$0xff]  ;;  %v515_v17 = vadd.f32 %v1522_v19, %v241_v9  ;;  %v244_v18 = vld [vmem:[%s1487_s6 + $0x110] sm:$0xff] }
  0x31   : > { %747 = vst [vmem:[%s1524_s18 + $0x38] sm:$0xff] %v491_v26  ;;  %v516_v20 = vadd.f32 %v1499_v3, %v242_v13  ;;  %v245_v21 = vld [vmem:[%s1487_s6 + $0x118] sm:$0xff]  ;;  %v517_v22 = vadd.f32 %v1501_v4, %v243_v15  ;;  %v246_v23 = vld [vmem:[%s1487_s6 + $0x120] sm:$0xff]  ;;  %v518_v24 = vadd.f32 %v1504_v6, %v244_v18  ;;  %v247_v25 = vld [vmem:[%s1487_s6 + $0x128] sm:$0xff]  ;;  %p1298_p1 = pnand %p1297_p0, %p1293_p7 }
  0x32   : > { %748 = vst [vmem:[%s1524_s18 + $0x40] sm:$0xff] %v492_v28  ;;  %v519_v26 = vadd.f32 %v1507_v8, %v245_v21  ;;  %v248_v27 = vld [vmem:[%s1487_s6 + $0x130] sm:$0xff]  ;;  %v520_v28 = vadd.f32 %v1510_v10, %v246_v23  ;;  %v249_v29 = vld [vmem:[%s1487_s6 + $0x138] sm:$0xff]  ;;  %v250_v31 = vld [vmem:[%s1487_s6 + $0x140] sm:$0xff] }
  0x33   : > { %749 = vst [vmem:[%s1524_s18 + $0x48] sm:$0xff] %v493_v30  ;;  %v521_v30 = vadd.f32 %v1512_v11, %v247_v25  ;;  %v251_v33 = vld [vmem:[%s1487_s6 + $0x148] sm:$0xff]  ;;  %v252_v35 = vld [vmem:[%s1487_s6 + $0x150] sm:$0xff]  ;;  %v253_v37 = vld [vmem:[%s1487_s6 + $0x158] sm:$0xff] }
  0x34   : > { %750 = vst [vmem:[%s1524_s18 + $0x50] sm:$0xff] %v494_v32  ;;  %v522_v32 = vadd.f32 %v1518_v16, %v248_v27  ;;  %v254_v39 = vld [vmem:[%s1487_s6 + $0x160] sm:$0xff]  ;;  %v255_v41 = vld [vmem:[%s1487_s6 + $0x168] sm:$0xff]  ;;  %v256_v43 = vld [vmem:[%s1487_s6 + $0x170] sm:$0xff] }
  0x35   : > { %751 = vst [vmem:[%s1524_s18 + $0x58] sm:$0xff] %v495_v34  ;;  %v523_v34 = vadd.f32 %v1522_v19, %v249_v29  ;;  %v257_v45 = vld [vmem:[%s1487_s6 + $0x178] sm:$0xff]  ;;  %v258_v47 = vld [vmem:[%s1487_s6 + $0x180] sm:$0xff]  ;;  %v259_v49 = vld [vmem:[%s1487_s6 + $0x188] sm:$0xff] }
  0x36   : > { %752 = vst [vmem:[%s1524_s18 + $0x60] sm:$0xff] %v496_v36  ;;  %v524_v36 = vadd.f32 %v1499_v3, %v250_v31  ;;  %v260_v51 = vld [vmem:[%s1487_s6 + $0x190] sm:$0xff]  ;;  %v261_v53 = vld [vmem:[%s1487_s6 + $0x198] sm:$0xff]  ;;  %v262_v55 = vld [vmem:[%s1487_s6 + $0x1a0] sm:$0xff] }
  0x37   : > { %753 = vst [vmem:[%s1524_s18 + $0x68] sm:$0xff] %v497_v38  ;;  %v525_v38 = vadd.f32 %v1501_v4, %v251_v33  ;;  %v263_v57 = vld [vmem:[%s1487_s6 + $0x1a8] sm:$0xff]  ;;  %v264_v59 = vld [vmem:[%s1487_s6 + $0x1b0] sm:$0xff]  ;;  %v265_v61 = vld [vmem:[%s1487_s6 + $0x1b8] sm:$0xff] }
  0x38   : > { %754 = vst [vmem:[%s1524_s18 + $0x70] sm:$0xff] %v498_v40  ;;  %v526_v40 = vadd.f32 %v1504_v6, %v252_v35  ;;  %v266_v63 = vld [vmem:[%s1487_s6 + $0x1c0] sm:$0xff]  ;;  %v267_v1 = vld [vmem:[%s1487_s6 + $0x1c8] sm:$0xff]  ;;  %v268_v5 = vld [vmem:[%s1487_s6 + $0x1d0] sm:$0xff] }
  0x39   : > { %755 = vst [vmem:[%s1524_s18 + $0x78] sm:$0xff] %v499_v42  ;;  %v527_v42 = vadd.f32 %v1507_v8, %v253_v37  ;;  %v269_v9 = vld [vmem:[%s1487_s6 + $0x1d8] sm:$0xff]  ;;  %v270_v13 = vld [vmem:[%s1487_s6 + $0x1e0] sm:$0xff]  ;;  %v271_v15 = vld [vmem:[%s1487_s6 + $0x1e8] sm:$0xff] }
  0x3a   : > { %756 = vst [vmem:[%s1524_s18 + $0x80] sm:$0xff] %v500_v44  ;;  %v528_v44 = vadd.f32 %v1510_v10, %v254_v39  ;;  %v272_v18 = vld [vmem:[%s1487_s6 + $0x1f0] sm:$0xff]  ;;  %v273_v21 = vld [vmem:[%s1487_s6 + $0x1f8] sm:$0xff]  ;;  %v274_v23 = vld [vmem:[%s1487_s6 + $0x200] sm:$0xff] }
  0x3b   : > { %757 = vst [vmem:[%s1524_s18 + $0x88] sm:$0xff] %v501_v46  ;;  %v529_v46 = vadd.f32 %v1512_v11, %v255_v41  ;;  %v275_v25 = vld [vmem:[%s1487_s6 + $0x208] sm:$0xff]  ;;  %v276_v27 = vld [vmem:[%s1487_s6 + $0x210] sm:$0xff]  ;;  %v277_v29 = vld [vmem:[%s1487_s6 + $0x218] sm:$0xff] }
  0x3c   : > { %758 = vst [vmem:[%s1524_s18 + $0x90] sm:$0xff] %v502_v48  ;;  %v530_v48 = vadd.f32 %v1518_v16, %v256_v43  ;;  %v278_v31 = vld [vmem:[%s1487_s6 + $0x220] sm:$0xff]  ;;  %v279_v33 = vld [vmem:[%s1487_s6 + $0x228] sm:$0xff]  ;;  %v280_v35 = vld [vmem:[%s1487_s6 + $0x230] sm:$0xff] }
  0x3d   : > { %759 = vst [vmem:[%s1524_s18 + $0x98] sm:$0xff] %v503_v50  ;;  %v531_v50 = vadd.f32 %v1522_v19, %v257_v45  ;;  %v281_v37 = vld [vmem:[%s1487_s6 + $0x238] sm:$0xff]  ;;  %v282_v39 = vld [vmem:[%s1487_s6 + $0x240] sm:$0xff]  ;;  %v283_v41 = vld [vmem:[%s1487_s6 + $0x248] sm:$0xff] }
  0x3e   : > { %760 = vst [vmem:[%s1524_s18 + $0xa0] sm:$0xff] %v504_v52  ;;  %v532_v52 = vadd.f32 %v1499_v3, %v258_v47  ;;  %v284_v43 = vld [vmem:[%s1487_s6 + $0x250] sm:$0xff]  ;;  %v285_v45 = vld [vmem:[%s1487_s6 + $0x258] sm:$0xff]  ;;  %v286_v47 = vld [vmem:[%s1487_s6 + $0x260] sm:$0xff] }
  0x3f   : > { %761 = vst [vmem:[%s1524_s18 + $0xa8] sm:$0xff] %v505_v54  ;;  %v533_v54 = vadd.f32 %v1501_v4, %v259_v49  ;;  %v287_v49 = vld [vmem:[%s1487_s6 + $0x268] sm:$0xff] }
  0x40   : > { %762 = vst [vmem:[%s1524_s18 + $0xb0] sm:$0xff] %v506_v56  ;;  %v534_v56 = vadd.f32 %v1504_v6, %v260_v51  ;;  %v288_v51 = vld [vmem:[%s1487_s6 + $0x270] sm:$0xff] }
  0x41   : > { %763 = vst [vmem:[%s1524_s18 + $0xb8] sm:$0xff] %v507_v58  ;;  %v535_v58 = vadd.f32 %v1507_v8, %v261_v53  ;;  %v289_v53 = vld [vmem:[%s1487_s6 + $0x278] sm:$0xff] }
  0x42   : > { %764 = vst [vmem:[%s1524_s18 + $0xc0] sm:$0xff] %v508_v60  ;;  %v536_v60 = vadd.f32 %v1510_v10, %v262_v55  ;;  %v290_v55 = vld [vmem:[%s1487_s6 + $0x280] sm:$0xff] }
  0x43   : > { %765 = vst [vmem:[%s1524_s18 + $0xc8] sm:$0xff] %v509_v62  ;;  %v537_v62 = vadd.f32 %v1512_v11, %v263_v57  ;;  %v291_v57 = vld [vmem:[%s1487_s6 + $0x288] sm:$0xff] }
  0x44   : > { %766 = vst [vmem:[%s1524_s18 + $0xd0] sm:$0xff] %v510_v0  ;;  %v538_v0 = vadd.f32 %v1518_v16, %v264_v59  ;;  %v292_v59 = vld [vmem:[%s1487_s6 + $0x290] sm:$0xff] }
  0x45   : > { %767 = vst [vmem:[%s1524_s18 + $0xd8] sm:$0xff] %v511_v2  ;;  %v539_v2 = vadd.f32 %v1522_v19, %v265_v61  ;;  %v293_v61 = vld [vmem:[%s1487_s6 + $0x298] sm:$0xff] }
  0x46   : > { %768 = vst [vmem:[%s1524_s18 + $0xe0] sm:$0xff] %v512_v7  ;;  %v540_v7 = vadd.f32 %v1499_v3, %v266_v63  ;;  %v294_v63 = vld [vmem:[%s1487_s6 + $0x2a0] sm:$0xff] }
  0x47   : > { %769 = vst [vmem:[%s1524_s18 + $0xe8] sm:$0xff] %v513_v12  ;;  %v541_v12 = vadd.f32 %v1501_v4, %v267_v1  ;;  %v295_v1 = vld [vmem:[%s1487_s6 + $0x2a8] sm:$0xff] }
  0x48   : > { %770 = vst [vmem:[%s1524_s18 + $0xf0] sm:$0xff] %v514_v14  ;;  %v542_v14 = vadd.f32 %v1504_v6, %v268_v5  ;;  %v296_v5 = vld [vmem:[%s1487_s6 + $0x2b0] sm:$0xff] }
  0x49   : > { %771 = vst [vmem:[%s1524_s18 + $0xf8] sm:$0xff] %v515_v17  ;;  %v543_v17 = vadd.f32 %v1507_v8, %v269_v9  ;;  %v297_v9 = vld [vmem:[%s1487_s6 + $0x2b8] sm:$0xff] }
  0x4a   : > { %772 = vst [vmem:[%s1524_s18 + $0x100] sm:$0xff] %v516_v20  ;;  %v544_v20 = vadd.f32 %v1510_v10, %v270_v13  ;;  %v298_v13 = vld [vmem:[%s1487_s6 + $0x2c0] sm:$0xff] }
  0x4b   : > { %773 = vst [vmem:[%s1524_s18 + $0x108] sm:$0xff] %v517_v22  ;;  %v545_v22 = vadd.f32 %v1512_v11, %v271_v15  ;;  %v299_v15 = vld [vmem:[%s1487_s6 + $0x2c8] sm:$0xff] }
  0x4c   : > { %774 = vst [vmem:[%s1524_s18 + $0x110] sm:$0xff] %v518_v24  ;;  %v546_v24 = vadd.f32 %v1518_v16, %v272_v18  ;;  %v300_v18 = vld [vmem:[%s1487_s6 + $0x2d0] sm:$0xff] }
  0x4d   : > { %775 = vst [vmem:[%s1524_s18 + $0x118] sm:$0xff] %v519_v26  ;;  %v547_v26 = vadd.f32 %v1522_v19, %v273_v21  ;;  %v301_v21 = vld [vmem:[%s1487_s6 + $0x2d8] sm:$0xff] }
  0x4e   : > { %776 = vst [vmem:[%s1524_s18 + $0x120] sm:$0xff] %v520_v28  ;;  %v548_v28 = vadd.f32 %v1499_v3, %v274_v23  ;;  %v302_v23 = vld [vmem:[%s1487_s6 + $0x2e0] sm:$0xff] }
  0x4f   : > { %777 = vst [vmem:[%s1524_s18 + $0x128] sm:$0xff] %v521_v30  ;;  %v549_v30 = vadd.f32 %v1501_v4, %v275_v25  ;;  %v303_v25 = vld [vmem:[%s1487_s6 + $0x2e8] sm:$0xff] }
  0x50   : > { %778 = vst [vmem:[%s1524_s18 + $0x130] sm:$0xff] %v522_v32  ;;  %v550_v32 = vadd.f32 %v1504_v6, %v276_v27  ;;  %v304_v27 = vld [vmem:[%s1487_s6 + $0x2f0] sm:$0xff] }
  0x51   : > { %779 = vst [vmem:[%s1524_s18 + $0x138] sm:$0xff] %v523_v34  ;;  %v551_v34 = vadd.f32 %v1507_v8, %v277_v29  ;;  %v305_v29 = vld [vmem:[%s1487_s6 + $0x2f8] sm:$0xff] }
  0x52   : > { %780 = vst [vmem:[%s1524_s18 + $0x140] sm:$0xff] %v524_v36  ;;  %v552_v36 = vadd.f32 %v1510_v10, %v278_v31  ;;  %v306_v31 = vld [vmem:[%s1487_s6 + $0x300] sm:$0xff] }
  0x53   : > { %781 = vst [vmem:[%s1524_s18 + $0x148] sm:$0xff] %v525_v38  ;;  %v553_v38 = vadd.f32 %v1512_v11, %v279_v33  ;;  %v307_v33 = vld [vmem:[%s1487_s6 + $0x308] sm:$0xff] }
  0x54   : > { %782 = vst [vmem:[%s1524_s18 + $0x150] sm:$0xff] %v526_v40  ;;  %v554_v40 = vadd.f32 %v1518_v16, %v280_v35  ;;  %v308_v35 = vld [vmem:[%s1487_s6 + $0x310] sm:$0xff] }
  0x55   : > { %783 = vst [vmem:[%s1524_s18 + $0x158] sm:$0xff] %v527_v42  ;;  %v555_v42 = vadd.f32 %v1522_v19, %v281_v37  ;;  %v309_v37 = vld [vmem:[%s1487_s6 + $0x318] sm:$0xff] }
  0x56   : > { %784 = vst [vmem:[%s1524_s18 + $0x160] sm:$0xff] %v528_v44  ;;  %v556_v44 = vadd.f32 %v1499_v3, %v282_v39  ;;  %v310_v39 = vld [vmem:[%s1487_s6 + $0x320] sm:$0xff] }
  0x57   : > { %785 = vst [vmem:[%s1524_s18 + $0x168] sm:$0xff] %v529_v46  ;;  %v557_v46 = vadd.f32 %v1501_v4, %v283_v41  ;;  %v311_v41 = vld [vmem:[%s1487_s6 + $0x328] sm:$0xff] }
  0x58   : > { %786 = vst [vmem:[%s1524_s18 + $0x170] sm:$0xff] %v530_v48  ;;  %v558_v48 = vadd.f32 %v1504_v6, %v284_v43  ;;  %v312_v43 = vld [vmem:[%s1487_s6 + $0x330] sm:$0xff] }
  0x59   : > { %787 = vst [vmem:[%s1524_s18 + $0x178] sm:$0xff] %v531_v50  ;;  %v559_v50 = vadd.f32 %v1507_v8, %v285_v45  ;;  %v313_v45 = vld [vmem:[%s1487_s6 + $0x338] sm:$0xff] }
  0x5a   : > { %788 = vst [vmem:[%s1524_s18 + $0x180] sm:$0xff] %v532_v52  ;;  %v560_v52 = vadd.f32 %v1510_v10, %v286_v47  ;;  %v314_v47 = vld [vmem:[%s1487_s6 + $0x340] sm:$0xff] }
  0x5b   : > { %789 = vst [vmem:[%s1524_s18 + $0x188] sm:$0xff] %v533_v54  ;;  %v561_v54 = vadd.f32 %v1512_v11, %v287_v49  ;;  %v315_v49 = vld [vmem:[%s1487_s6 + $0x348] sm:$0xff] }
  0x5c   : > { %790 = vst [vmem:[%s1524_s18 + $0x190] sm:$0xff] %v534_v56  ;;  %v562_v56 = vadd.f32 %v1518_v16, %v288_v51  ;;  %v316_v51 = vld [vmem:[%s1487_s6 + $0x350] sm:$0xff] }
  0x5d   : > { %791 = vst [vmem:[%s1524_s18 + $0x198] sm:$0xff] %v535_v58  ;;  %v563_v58 = vadd.f32 %v1522_v19, %v289_v53  ;;  %v317_v53 = vld [vmem:[%s1487_s6 + $0x358] sm:$0xff] }
  0x5e   : > { %792 = vst [vmem:[%s1524_s18 + $0x1a0] sm:$0xff] %v536_v60  ;;  %v564_v60 = vadd.f32 %v1499_v3, %v290_v55  ;;  %v318_v55 = vld [vmem:[%s1487_s6 + $0x360] sm:$0xff] }
  0x5f   : > { %793 = vst [vmem:[%s1524_s18 + $0x1a8] sm:$0xff] %v537_v62  ;;  %v565_v62 = vadd.f32 %v1501_v4, %v291_v57  ;;  %v319_v57 = vld [vmem:[%s1487_s6 + $0x368] sm:$0xff] }
  0x60   : > { %794 = vst [vmem:[%s1524_s18 + $0x1b0] sm:$0xff] %v538_v0  ;;  %v566_v0 = vadd.f32 %v1504_v6, %v292_v59  ;;  %v320_v59 = vld [vmem:[%s1487_s6 + $0x370] sm:$0xff] }
  0x61   : > { %795 = vst [vmem:[%s1524_s18 + $0x1b8] sm:$0xff] %v539_v2  ;;  %v567_v2 = vadd.f32 %v1507_v8, %v293_v61  ;;  %v321_v61 = vld [vmem:[%s1487_s6 + $0x378] sm:$0xff] }
  0x62   : > { %796 = vst [vmem:[%s1524_s18 + $0x1c0] sm:$0xff] %v540_v7  ;;  %v568_v7 = vadd.f32 %v1510_v10, %v294_v63  ;;  %v322_v63 = vld [vmem:[%s1487_s6 + $0x380] sm:$0xff] }
  0x63   : > { %797 = vst [vmem:[%s1524_s18 + $0x1c8] sm:$0xff] %v541_v12  ;;  %v569_v12 = vadd.f32 %v1512_v11, %v295_v1  ;;  %v323_v1 = vld [vmem:[%s1487_s6 + $0x388] sm:$0xff] }
  0x64   : > { %798 = vst [vmem:[%s1524_s18 + $0x1d0] sm:$0xff] %v542_v14  ;;  %v570_v14 = vadd.f32 %v1518_v16, %v296_v5  ;;  %v324_v5 = vld [vmem:[%s1487_s6 + $0x390] sm:$0xff] }
  0x65   : > { %799 = vst [vmem:[%s1524_s18 + $0x1d8] sm:$0xff] %v543_v17  ;;  %v571_v17 = vadd.f32 %v1522_v19, %v297_v9  ;;  %v325_v9 = vld [vmem:[%s1487_s6 + $0x398] sm:$0xff] }
  0x66   : > { %800 = vst [vmem:[%s1524_s18 + $0x1e0] sm:$0xff] %v544_v20  ;;  %v572_v20 = vadd.f32 %v1499_v3, %v298_v13  ;;  %v326_v13 = vld [vmem:[%s1487_s6 + $0x3a0] sm:$0xff] }
  0x67   : > { %801 = vst [vmem:[%s1524_s18 + $0x1e8] sm:$0xff] %v545_v22  ;;  %v573_v22 = vadd.f32 %v1501_v4, %v299_v15  ;;  %v327_v15 = vld [vmem:[%s1487_s6 + $0x3a8] sm:$0xff] }
  0x68   : > { %802 = vst [vmem:[%s1524_s18 + $0x1f0] sm:$0xff] %v546_v24  ;;  %v574_v24 = vadd.f32 %v1504_v6, %v300_v18  ;;  %v328_v18 = vld [vmem:[%s1487_s6 + $0x3b0] sm:$0xff] }
  0x69   : > { %803 = vst [vmem:[%s1524_s18 + $0x1f8] sm:$0xff] %v547_v26  ;;  %v575_v26 = vadd.f32 %v1507_v8, %v301_v21  ;;  %v329_v21 = vld [vmem:[%s1487_s6 + $0x3b8] sm:$0xff] }
  0x6a   : > { %804 = vst [vmem:[%s1524_s18 + $0x200] sm:$0xff] %v548_v28  ;;  %v576_v28 = vadd.f32 %v1510_v10, %v302_v23  ;;  %v330_v23 = vld [vmem:[%s1487_s6 + $0x3c0] sm:$0xff] }
  0x6b   : > { %805 = vst [vmem:[%s1524_s18 + $0x208] sm:$0xff] %v549_v30  ;;  %v577_v30 = vadd.f32 %v1512_v11, %v303_v25  ;;  %v331_v25 = vld [vmem:[%s1487_s6 + $0x3c8] sm:$0xff] }
  0x6c   : > { %806 = vst [vmem:[%s1524_s18 + $0x210] sm:$0xff] %v550_v32  ;;  %v578_v32 = vadd.f32 %v1518_v16, %v304_v27  ;;  %v332_v27 = vld [vmem:[%s1487_s6 + $0x3d0] sm:$0xff] }
  0x6d   : > { %807 = vst [vmem:[%s1524_s18 + $0x218] sm:$0xff] %v551_v34  ;;  %v579_v34 = vadd.f32 %v1522_v19, %v305_v29  ;;  %v333_v29 = vld [vmem:[%s1487_s6 + $0x3d8] sm:$0xff] }
  0x6e   : > { %808 = vst [vmem:[%s1524_s18 + $0x220] sm:$0xff] %v552_v36  ;;  %v580_v36 = vadd.f32 %v1499_v3, %v306_v31  ;;  %v334_v31 = vld [vmem:[%s1487_s6 + $0x3e0] sm:$0xff] }
  0x6f   : > { %809 = vst [vmem:[%s1524_s18 + $0x228] sm:$0xff] %v553_v38  ;;  %v581_v38 = vadd.f32 %v1501_v4, %v307_v33  ;;  %v335_v33 = vld [vmem:[%s1487_s6 + $0x3e8] sm:$0xff] }
  0x70   : > { %810 = vst [vmem:[%s1524_s18 + $0x230] sm:$0xff] %v554_v40  ;;  %v582_v40 = vadd.f32 %v1504_v6, %v308_v35  ;;  %v336_v35 = vld [vmem:[%s1487_s6 + $0x3f0] sm:$0xff] }
  0x71   : > { %811 = vst [vmem:[%s1524_s18 + $0x238] sm:$0xff] %v555_v42  ;;  %v583_v42 = vadd.f32 %v1507_v8, %v309_v37  ;;  %v337_v37 = vld [vmem:[%s1487_s6 + $0x3f8] sm:$0xff] }
  0x72   : > { %812 = vst [vmem:[%s1524_s18 + $0x240] sm:$0xff] %v556_v44  ;;  %v584_v44 = vadd.f32 %v1510_v10, %v310_v39  ;;  %v338_v39 = vld [vmem:[%s1487_s6 + $0x400] sm:$0xff] }
  0x73   : > { %813 = vst [vmem:[%s1524_s18 + $0x248] sm:$0xff] %v557_v46  ;;  %v585_v46 = vadd.f32 %v1512_v11, %v311_v41  ;;  %v339_v41 = vld [vmem:[%s1487_s6 + $0x408] sm:$0xff] }
  0x74   : > { %814 = vst [vmem:[%s1524_s18 + $0x250] sm:$0xff] %v558_v48  ;;  %v586_v48 = vadd.f32 %v1518_v16, %v312_v43  ;;  %v340_v43 = vld [vmem:[%s1487_s6 + $0x410] sm:$0xff] }
  0x75   : > { %815 = vst [vmem:[%s1524_s18 + $0x258] sm:$0xff] %v559_v50  ;;  %v587_v50 = vadd.f32 %v1522_v19, %v313_v45  ;;  %v341_v45 = vld [vmem:[%s1487_s6 + $0x418] sm:$0xff] }
  0x76   : > { %816 = vst [vmem:[%s1524_s18 + $0x260] sm:$0xff] %v560_v52  ;;  %v588_v52 = vadd.f32 %v1499_v3, %v314_v47  ;;  %v342_v47 = vld [vmem:[%s1487_s6 + $0x420] sm:$0xff] }
  0x77   : > { %817 = vst [vmem:[%s1524_s18 + $0x268] sm:$0xff] %v561_v54  ;;  %v589_v54 = vadd.f32 %v1501_v4, %v315_v49  ;;  %v343_v49 = vld [vmem:[%s1487_s6 + $0x428] sm:$0xff] }
  0x78   : > { %818 = vst [vmem:[%s1524_s18 + $0x270] sm:$0xff] %v562_v56  ;;  %v590_v56 = vadd.f32 %v1504_v6, %v316_v51  ;;  %v344_v51 = vld [vmem:[%s1487_s6 + $0x430] sm:$0xff] }
  0x79   : > { %819 = vst [vmem:[%s1524_s18 + $0x278] sm:$0xff] %v563_v58  ;;  %v591_v58 = vadd.f32 %v1507_v8, %v317_v53  ;;  %v345_v53 = vld [vmem:[%s1487_s6 + $0x438] sm:$0xff] }
  0x7a   : > { %820 = vst [vmem:[%s1524_s18 + $0x280] sm:$0xff] %v564_v60  ;;  %v592_v60 = vadd.f32 %v1510_v10, %v318_v55  ;;  %v346_v55 = vld [vmem:[%s1487_s6 + $0x440] sm:$0xff] }
  0x7b   : > { %821 = vst [vmem:[%s1524_s18 + $0x288] sm:$0xff] %v565_v62  ;;  %v593_v62 = vadd.f32 %v1512_v11, %v319_v57  ;;  %v347_v57 = vld [vmem:[%s1487_s6 + $0x448] sm:$0xff] }
  0x7c   : > { %822 = vst [vmem:[%s1524_s18 + $0x290] sm:$0xff] %v566_v0  ;;  %v594_v0 = vadd.f32 %v1518_v16, %v320_v59  ;;  %v348_v59 = vld [vmem:[%s1487_s6 + $0x450] sm:$0xff] }
  0x7d   : > { %823 = vst [vmem:[%s1524_s18 + $0x298] sm:$0xff] %v567_v2  ;;  %v595_v2 = vadd.f32 %v1522_v19, %v321_v61  ;;  %v349_v61 = vld [vmem:[%s1487_s6 + $0x458] sm:$0xff] }
  0x7e   : > { %824 = vst [vmem:[%s1524_s18 + $0x2a0] sm:$0xff] %v568_v7  ;;  %v596_v7 = vadd.f32 %v1499_v3, %v322_v63  ;;  %v350_v63 = vld [vmem:[%s1487_s6 + $0x460] sm:$0xff] }
  0x7f   : > { %825 = vst [vmem:[%s1524_s18 + $0x2a8] sm:$0xff] %v569_v12  ;;  %v597_v12 = vadd.f32 %v1501_v4, %v323_v1  ;;  %v351_v1 = vld [vmem:[%s1487_s6 + $0x468] sm:$0xff] }
  0x80   : > { %826 = vst [vmem:[%s1524_s18 + $0x2b0] sm:$0xff] %v570_v14  ;;  %v598_v14 = vadd.f32 %v1504_v6, %v324_v5  ;;  %v352_v5 = vld [vmem:[%s1487_s6 + $0x470] sm:$0xff] }
  0x81   : > { %827 = vst [vmem:[%s1524_s18 + $0x2b8] sm:$0xff] %v571_v17  ;;  %v599_v17 = vadd.f32 %v1507_v8, %v325_v9  ;;  %v353_v9 = vld [vmem:[%s1487_s6 + $0x478] sm:$0xff] }
  0x82   : > { %828 = vst [vmem:[%s1524_s18 + $0x2c0] sm:$0xff] %v572_v20  ;;  %v600_v20 = vadd.f32 %v1510_v10, %v326_v13  ;;  %v354_v13 = vld [vmem:[%s1487_s6 + $0x480] sm:$0xff] }
  0x83   : > { %829 = vst [vmem:[%s1524_s18 + $0x2c8] sm:$0xff] %v573_v22  ;;  %v601_v22 = vadd.f32 %v1512_v11, %v327_v15  ;;  %v355_v15 = vld [vmem:[%s1487_s6 + $0x488] sm:$0xff] }
  0x84   : > { %830 = vst [vmem:[%s1524_s18 + $0x2d0] sm:$0xff] %v574_v24  ;;  %v602_v24 = vadd.f32 %v1518_v16, %v328_v18  ;;  %v356_v18 = vld [vmem:[%s1487_s6 + $0x490] sm:$0xff] }
  0x85   : > { %831 = vst [vmem:[%s1524_s18 + $0x2d8] sm:$0xff] %v575_v26  ;;  %v603_v26 = vadd.f32 %v1522_v19, %v329_v21  ;;  %v357_v21 = vld [vmem:[%s1487_s6 + $0x498] sm:$0xff] }
  0x86   : > { %832 = vst [vmem:[%s1524_s18 + $0x2e0] sm:$0xff] %v576_v28  ;;  %v604_v28 = vadd.f32 %v1499_v3, %v330_v23  ;;  %v358_v23 = vld [vmem:[%s1487_s6 + $0x4a0] sm:$0xff] }
  0x87   : > { %833 = vst [vmem:[%s1524_s18 + $0x2e8] sm:$0xff] %v577_v30  ;;  %v605_v30 = vadd.f32 %v1501_v4, %v331_v25  ;;  %v359_v25 = vld [vmem:[%s1487_s6 + $0x4a8] sm:$0xff] }
  0x88   : > { %834 = vst [vmem:[%s1524_s18 + $0x2f0] sm:$0xff] %v578_v32  ;;  %v606_v32 = vadd.f32 %v1504_v6, %v332_v27  ;;  %v360_v27 = vld [vmem:[%s1487_s6 + $0x4b0] sm:$0xff] }
  0x89   : > { %835 = vst [vmem:[%s1524_s18 + $0x2f8] sm:$0xff] %v579_v34  ;;  %v607_v34 = vadd.f32 %v1507_v8, %v333_v29  ;;  %v361_v29 = vld [vmem:[%s1487_s6 + $0x4b8] sm:$0xff] }
  0x8a   : > { %836 = vst [vmem:[%s1524_s18 + $0x300] sm:$0xff] %v580_v36  ;;  %v608_v36 = vadd.f32 %v1510_v10, %v334_v31  ;;  %v362_v31 = vld [vmem:[%s1487_s6 + $0x4c0] sm:$0xff] }
  0x8b   : > { %837 = vst [vmem:[%s1524_s18 + $0x308] sm:$0xff] %v581_v38  ;;  %v609_v38 = vadd.f32 %v1512_v11, %v335_v33  ;;  %v363_v33 = vld [vmem:[%s1487_s6 + $0x4c8] sm:$0xff] }
  0x8c   : > { %838 = vst [vmem:[%s1524_s18 + $0x310] sm:$0xff] %v582_v40  ;;  %v610_v40 = vadd.f32 %v1518_v16, %v336_v35  ;;  %v364_v35 = vld [vmem:[%s1487_s6 + $0x4d0] sm:$0xff] }
  0x8d   : > { %839 = vst [vmem:[%s1524_s18 + $0x318] sm:$0xff] %v583_v42  ;;  %v611_v42 = vadd.f32 %v1522_v19, %v337_v37  ;;  %v365_v37 = vld [vmem:[%s1487_s6 + $0x4d8] sm:$0xff] }
  0x8e   : > { %840 = vst [vmem:[%s1524_s18 + $0x320] sm:$0xff] %v584_v44  ;;  %v612_v44 = vadd.f32 %v1499_v3, %v338_v39  ;;  %v366_v39 = vld [vmem:[%s1487_s6 + $0x4e0] sm:$0xff] }
  0x8f   : > { %841 = vst [vmem:[%s1524_s18 + $0x328] sm:$0xff] %v585_v46  ;;  %v613_v46 = vadd.f32 %v1501_v4, %v339_v41  ;;  %v367_v41 = vld [vmem:[%s1487_s6 + $0x4e8] sm:$0xff] }
  0x90   : > { %842 = vst [vmem:[%s1524_s18 + $0x330] sm:$0xff] %v586_v48  ;;  %v614_v48 = vadd.f32 %v1504_v6, %v340_v43  ;;  %v368_v43 = vld [vmem:[%s1487_s6 + $0x4f0] sm:$0xff] }
  0x91   : > { %843 = vst [vmem:[%s1524_s18 + $0x338] sm:$0xff] %v587_v50  ;;  %v615_v50 = vadd.f32 %v1507_v8, %v341_v45  ;;  %v369_v45 = vld [vmem:[%s1487_s6 + $0x4f8] sm:$0xff] }
  0x92   : > { %844 = vst [vmem:[%s1524_s18 + $0x340] sm:$0xff] %v588_v52  ;;  %v616_v52 = vadd.f32 %v1510_v10, %v342_v47  ;;  %v370_v47 = vld [vmem:[%s1487_s6 + $0x500] sm:$0xff] }
  0x93   : > { %845 = vst [vmem:[%s1524_s18 + $0x348] sm:$0xff] %v589_v54  ;;  %v617_v54 = vadd.f32 %v1512_v11, %v343_v49  ;;  %v371_v49 = vld [vmem:[%s1487_s6 + $0x508] sm:$0xff] }
  0x94   : > { %846 = vst [vmem:[%s1524_s18 + $0x350] sm:$0xff] %v590_v56  ;;  %v618_v56 = vadd.f32 %v1518_v16, %v344_v51  ;;  %v372_v51 = vld [vmem:[%s1487_s6 + $0x510] sm:$0xff] }
  0x95   : > { %847 = vst [vmem:[%s1524_s18 + $0x358] sm:$0xff] %v591_v58  ;;  %v619_v58 = vadd.f32 %v1522_v19, %v345_v53  ;;  %v373_v53 = vld [vmem:[%s1487_s6 + $0x518] sm:$0xff] }
  0x96   : > { %848 = vst [vmem:[%s1524_s18 + $0x360] sm:$0xff] %v592_v60  ;;  %v620_v60 = vadd.f32 %v1499_v3, %v346_v55  ;;  %v374_v55 = vld [vmem:[%s1487_s6 + $0x520] sm:$0xff] }
  0x97   : > { %849 = vst [vmem:[%s1524_s18 + $0x368] sm:$0xff] %v593_v62  ;;  %v621_v62 = vadd.f32 %v1501_v4, %v347_v57  ;;  %v375_v57 = vld [vmem:[%s1487_s6 + $0x528] sm:$0xff] }
  0x98   : > { %850 = vst [vmem:[%s1524_s18 + $0x370] sm:$0xff] %v594_v0  ;;  %v622_v0 = vadd.f32 %v1504_v6, %v348_v59  ;;  %v376_v59 = vld [vmem:[%s1487_s6 + $0x530] sm:$0xff] }
  0x99   : > { %851 = vst [vmem:[%s1524_s18 + $0x378] sm:$0xff] %v595_v2  ;;  %v623_v2 = vadd.f32 %v1507_v8, %v349_v61  ;;  %v377_v61 = vld [vmem:[%s1487_s6 + $0x538] sm:$0xff] }
  0x9a   : > { %852 = vst [vmem:[%s1524_s18 + $0x380] sm:$0xff] %v596_v7  ;;  %v624_v7 = vadd.f32 %v1510_v10, %v350_v63  ;;  %v378_v63 = vld [vmem:[%s1487_s6 + $0x540] sm:$0xff] }
  0x9b   : > { %853 = vst [vmem:[%s1524_s18 + $0x388] sm:$0xff] %v597_v12  ;;  %v625_v12 = vadd.f32 %v1512_v11, %v351_v1  ;;  %v379_v1 = vld [vmem:[%s1487_s6 + $0x548] sm:$0xff] }
  0x9c   : > { %854 = vst [vmem:[%s1524_s18 + $0x390] sm:$0xff] %v598_v14  ;;  %v626_v14 = vadd.f32 %v1518_v16, %v352_v5  ;;  %v380_v5 = vld [vmem:[%s1487_s6 + $0x550] sm:$0xff] }
  0x9d   : > { %855 = vst [vmem:[%s1524_s18 + $0x398] sm:$0xff] %v599_v17  ;;  %v627_v17 = vadd.f32 %v1522_v19, %v353_v9  ;;  %v381_v9 = vld [vmem:[%s1487_s6 + $0x558] sm:$0xff] }
  0x9e   : > { %856 = vst [vmem:[%s1524_s18 + $0x3a0] sm:$0xff] %v600_v20  ;;  %v628_v20 = vadd.f32 %v1499_v3, %v354_v13  ;;  %v382_v13 = vld [vmem:[%s1487_s6 + $0x560] sm:$0xff] }
  0x9f   : > { %857 = vst [vmem:[%s1524_s18 + $0x3a8] sm:$0xff] %v601_v22  ;;  %v629_v22 = vadd.f32 %v1501_v4, %v355_v15  ;;  %v383_v15 = vld [vmem:[%s1487_s6 + $0x568] sm:$0xff] }
  0xa0   : > { %858 = vst [vmem:[%s1524_s18 + $0x3b0] sm:$0xff] %v602_v24  ;;  %v630_v24 = vadd.f32 %v1504_v6, %v356_v18  ;;  %v384_v18 = vld [vmem:[%s1487_s6 + $0x570] sm:$0xff] }
  0xa1   : > { %859 = vst [vmem:[%s1524_s18 + $0x3b8] sm:$0xff] %v603_v26  ;;  %v631_v26 = vadd.f32 %v1507_v8, %v357_v21  ;;  %v385_v21 = vld [vmem:[%s1487_s6 + $0x578] sm:$0xff] }
  0xa2   : > { %860 = vst [vmem:[%s1524_s18 + $0x3c0] sm:$0xff] %v604_v28  ;;  %v632_v28 = vadd.f32 %v1510_v10, %v358_v23  ;;  %v386_v23 = vld [vmem:[%s1487_s6 + $0x580] sm:$0xff] }
  0xa3   : > { %861 = vst [vmem:[%s1524_s18 + $0x3c8] sm:$0xff] %v605_v30  ;;  %v633_v30 = vadd.f32 %v1512_v11, %v359_v25  ;;  %v387_v25 = vld [vmem:[%s1487_s6 + $0x588] sm:$0xff] }
  0xa4   : > { %862 = vst [vmem:[%s1524_s18 + $0x3d0] sm:$0xff] %v606_v32  ;;  %v634_v32 = vadd.f32 %v1518_v16, %v360_v27  ;;  %v388_v27 = vld [vmem:[%s1487_s6 + $0x590] sm:$0xff] }
  0xa5   : > { %863 = vst [vmem:[%s1524_s18 + $0x3d8] sm:$0xff] %v607_v34  ;;  %v635_v34 = vadd.f32 %v1522_v19, %v361_v29  ;;  %v389_v29 = vld [vmem:[%s1487_s6 + $0x598] sm:$0xff] }
  0xa6   : > { %864 = vst [vmem:[%s1524_s18 + $0x3e0] sm:$0xff] %v608_v36  ;;  %v636_v36 = vadd.f32 %v1499_v3, %v362_v31  ;;  %v390_v31 = vld [vmem:[%s1487_s6 + $0x5a0] sm:$0xff] }
  0xa7   : > { %865 = vst [vmem:[%s1524_s18 + $0x3e8] sm:$0xff] %v609_v38  ;;  %v637_v38 = vadd.f32 %v1501_v4, %v363_v33  ;;  %v391_v33 = vld [vmem:[%s1487_s6 + $0x5a8] sm:$0xff] }
  0xa8   : > { %866 = vst [vmem:[%s1524_s18 + $0x3f0] sm:$0xff] %v610_v40  ;;  %v638_v40 = vadd.f32 %v1504_v6, %v364_v35  ;;  %v392_v35 = vld [vmem:[%s1487_s6 + $0x5b0] sm:$0xff] }
  0xa9   : > { %867 = vst [vmem:[%s1524_s18 + $0x3f8] sm:$0xff] %v611_v42  ;;  %v639_v42 = vadd.f32 %v1507_v8, %v365_v37  ;;  %v393_v37 = vld [vmem:[%s1487_s6 + $0x5b8] sm:$0xff] }
  0xaa   : > { %868 = vst [vmem:[%s1524_s18 + $0x400] sm:$0xff] %v612_v44  ;;  %v640_v44 = vadd.f32 %v1510_v10, %v366_v39  ;;  %v394_v39 = vld [vmem:[%s1487_s6 + $0x5c0] sm:$0xff] }
  0xab   : > { %869 = vst [vmem:[%s1524_s18 + $0x408] sm:$0xff] %v613_v46  ;;  %v641_v46 = vadd.f32 %v1512_v11, %v367_v41  ;;  %v395_v41 = vld [vmem:[%s1487_s6 + $0x5c8] sm:$0xff] }
  0xac   : > { %870 = vst [vmem:[%s1524_s18 + $0x410] sm:$0xff] %v614_v48  ;;  %v642_v48 = vadd.f32 %v1518_v16, %v368_v43  ;;  %v396_v43 = vld [vmem:[%s1487_s6 + $0x5d0] sm:$0xff] }
  0xad   : > { %871 = vst [vmem:[%s1524_s18 + $0x418] sm:$0xff] %v615_v50  ;;  %v643_v50 = vadd.f32 %v1522_v19, %v369_v45  ;;  %v397_v45 = vld [vmem:[%s1487_s6 + $0x5d8] sm:$0xff] }
  0xae   : > { %872 = vst [vmem:[%s1524_s18 + $0x420] sm:$0xff] %v616_v52  ;;  %v644_v52 = vadd.f32 %v1499_v3, %v370_v47  ;;  %v398_v47 = vld [vmem:[%s1487_s6 + $0x5e0] sm:$0xff] }
  0xaf   : > { %873 = vst [vmem:[%s1524_s18 + $0x428] sm:$0xff] %v617_v54  ;;  %v645_v54 = vadd.f32 %v1501_v4, %v371_v49  ;;  %v399_v49 = vld [vmem:[%s1487_s6 + $0x5e8] sm:$0xff] }
  0xb0   : > { %874 = vst [vmem:[%s1524_s18 + $0x430] sm:$0xff] %v618_v56  ;;  %v646_v56 = vadd.f32 %v1504_v6, %v372_v51  ;;  %v400_v51 = vld [vmem:[%s1487_s6 + $0x5f0] sm:$0xff] }
  0xb1   : > { %875 = vst [vmem:[%s1524_s18 + $0x438] sm:$0xff] %v619_v58  ;;  %v647_v58 = vadd.f32 %v1507_v8, %v373_v53  ;;  %v401_v53 = vld [vmem:[%s1487_s6 + $0x5f8] sm:$0xff] }
  0xb2   : > { %876 = vst [vmem:[%s1524_s18 + $0x440] sm:$0xff] %v620_v60  ;;  %v648_v60 = vadd.f32 %v1510_v10, %v374_v55  ;;  %v402_v55 = vld [vmem:[%s1487_s6 + $0x600] sm:$0xff] }
  0xb3   : > { %877 = vst [vmem:[%s1524_s18 + $0x448] sm:$0xff] %v621_v62  ;;  %v649_v62 = vadd.f32 %v1512_v11, %v375_v57  ;;  %v403_v57 = vld [vmem:[%s1487_s6 + $0x608] sm:$0xff] }
  0xb4   : > { %878 = vst [vmem:[%s1524_s18 + $0x450] sm:$0xff] %v622_v0  ;;  %v650_v0 = vadd.f32 %v1518_v16, %v376_v59  ;;  %v404_v59 = vld [vmem:[%s1487_s6 + $0x610] sm:$0xff] }
  0xb5   : > { %879 = vst [vmem:[%s1524_s18 + $0x458] sm:$0xff] %v623_v2  ;;  %v651_v2 = vadd.f32 %v1522_v19, %v377_v61  ;;  %v405_v61 = vld [vmem:[%s1487_s6 + $0x618] sm:$0xff] }
  0xb6   : > { %880 = vst [vmem:[%s1524_s18 + $0x460] sm:$0xff] %v624_v7  ;;  %v652_v7 = vadd.f32 %v1499_v3, %v378_v63  ;;  %v406_v63 = vld [vmem:[%s1487_s6 + $0x620] sm:$0xff] }
  0xb7   : > { %881 = vst [vmem:[%s1524_s18 + $0x468] sm:$0xff] %v625_v12  ;;  %v653_v12 = vadd.f32 %v1501_v4, %v379_v1  ;;  %v407_v1 = vld [vmem:[%s1487_s6 + $0x628] sm:$0xff] }
  0xb8   : > { %882 = vst [vmem:[%s1524_s18 + $0x470] sm:$0xff] %v626_v14  ;;  %v654_v14 = vadd.f32 %v1504_v6, %v380_v5  ;;  %v408_v5 = vld [vmem:[%s1487_s6 + $0x630] sm:$0xff] }
  0xb9   : > { %883 = vst [vmem:[%s1524_s18 + $0x478] sm:$0xff] %v627_v17  ;;  %v655_v17 = vadd.f32 %v1507_v8, %v381_v9  ;;  %v409_v9 = vld [vmem:[%s1487_s6 + $0x638] sm:$0xff] }
  0xba   : > { %884 = vst [vmem:[%s1524_s18 + $0x480] sm:$0xff] %v628_v20  ;;  %v656_v20 = vadd.f32 %v1510_v10, %v382_v13  ;;  %v410_v13 = vld [vmem:[%s1487_s6 + $0x640] sm:$0xff] }
  0xbb   : > { %885 = vst [vmem:[%s1524_s18 + $0x488] sm:$0xff] %v629_v22  ;;  %v657_v22 = vadd.f32 %v1512_v11, %v383_v15  ;;  %v411_v15 = vld [vmem:[%s1487_s6 + $0x648] sm:$0xff] }
  0xbc   : > { %886 = vst [vmem:[%s1524_s18 + $0x490] sm:$0xff] %v630_v24  ;;  %v658_v24 = vadd.f32 %v1518_v16, %v384_v18  ;;  %v412_v18 = vld [vmem:[%s1487_s6 + $0x650] sm:$0xff] }
  0xbd   : > { %887 = vst [vmem:[%s1524_s18 + $0x498] sm:$0xff] %v631_v26  ;;  %v659_v26 = vadd.f32 %v1522_v19, %v385_v21  ;;  %v413_v21 = vld [vmem:[%s1487_s6 + $0x658] sm:$0xff] }
  0xbe   : > { %888 = vst [vmem:[%s1524_s18 + $0x4a0] sm:$0xff] %v632_v28  ;;  %v660_v28 = vadd.f32 %v1499_v3, %v386_v23  ;;  %v414_v23 = vld [vmem:[%s1487_s6 + $0x660] sm:$0xff] }
  0xbf   : > { %889 = vst [vmem:[%s1524_s18 + $0x4a8] sm:$0xff] %v633_v30  ;;  %v661_v30 = vadd.f32 %v1501_v4, %v387_v25  ;;  %v415_v25 = vld [vmem:[%s1487_s6 + $0x668] sm:$0xff] }
  0xc0   : > { %890 = vst [vmem:[%s1524_s18 + $0x4b0] sm:$0xff] %v634_v32  ;;  %v662_v32 = vadd.f32 %v1504_v6, %v388_v27  ;;  %v416_v27 = vld [vmem:[%s1487_s6 + $0x670] sm:$0xff] }
  0xc1   : > { %891 = vst [vmem:[%s1524_s18 + $0x4b8] sm:$0xff] %v635_v34  ;;  %v663_v34 = vadd.f32 %v1507_v8, %v389_v29  ;;  %v417_v29 = vld [vmem:[%s1487_s6 + $0x678] sm:$0xff] }
  0xc2   : > { %892 = vst [vmem:[%s1524_s18 + $0x4c0] sm:$0xff] %v636_v36  ;;  %v664_v36 = vadd.f32 %v1510_v10, %v390_v31  ;;  %v418_v31 = vld [vmem:[%s1487_s6 + $0x680] sm:$0xff] }
  0xc3   : > { %893 = vst [vmem:[%s1524_s18 + $0x4c8] sm:$0xff] %v637_v38  ;;  %v665_v38 = vadd.f32 %v1512_v11, %v391_v33  ;;  %v419_v33 = vld [vmem:[%s1487_s6 + $0x688] sm:$0xff] }
  0xc4   : > { %894 = vst [vmem:[%s1524_s18 + $0x4d0] sm:$0xff] %v638_v40  ;;  %v666_v40 = vadd.f32 %v1518_v16, %v392_v35  ;;  %v420_v35 = vld [vmem:[%s1487_s6 + $0x690] sm:$0xff] }
  0xc5   : > { %895 = vst [vmem:[%s1524_s18 + $0x4d8] sm:$0xff] %v639_v42  ;;  %v667_v42 = vadd.f32 %v1522_v19, %v393_v37  ;;  %v421_v37 = vld [vmem:[%s1487_s6 + $0x698] sm:$0xff] }
  0xc6   : > { %896 = vst [vmem:[%s1524_s18 + $0x4e0] sm:$0xff] %v640_v44  ;;  %v668_v44 = vadd.f32 %v1499_v3, %v394_v39  ;;  %v422_v39 = vld [vmem:[%s1487_s6 + $0x6a0] sm:$0xff] }
  0xc7   : > { %897 = vst [vmem:[%s1524_s18 + $0x4e8] sm:$0xff] %v641_v46  ;;  %v669_v46 = vadd.f32 %v1501_v4, %v395_v41  ;;  %v423_v41 = vld [vmem:[%s1487_s6 + $0x6a8] sm:$0xff] }
  0xc8   : > { %898 = vst [vmem:[%s1524_s18 + $0x4f0] sm:$0xff] %v642_v48  ;;  %v670_v48 = vadd.f32 %v1504_v6, %v396_v43  ;;  %v424_v43 = vld [vmem:[%s1487_s6 + $0x6b0] sm:$0xff] }
  0xc9   : > { %899 = vst [vmem:[%s1524_s18 + $0x4f8] sm:$0xff] %v643_v50  ;;  %v671_v50 = vadd.f32 %v1507_v8, %v397_v45  ;;  %v425_v45 = vld [vmem:[%s1487_s6 + $0x6b8] sm:$0xff] }
  0xca   : > { %900 = vst [vmem:[%s1524_s18 + $0x500] sm:$0xff] %v644_v52  ;;  %v672_v52 = vadd.f32 %v1510_v10, %v398_v47  ;;  %v426_v47 = vld [vmem:[%s1487_s6 + $0x6c0] sm:$0xff] }
  0xcb   : > { %901 = vst [vmem:[%s1524_s18 + $0x508] sm:$0xff] %v645_v54  ;;  %v673_v54 = vadd.f32 %v1512_v11, %v399_v49  ;;  %v427_v49 = vld [vmem:[%s1487_s6 + $0x6c8] sm:$0xff] }
  0xcc   : > { %902 = vst [vmem:[%s1524_s18 + $0x510] sm:$0xff] %v646_v56  ;;  %v674_v56 = vadd.f32 %v1518_v16, %v400_v51  ;;  %v428_v51 = vld [vmem:[%s1487_s6 + $0x6d0] sm:$0xff] }
  0xcd   : > { %903 = vst [vmem:[%s1524_s18 + $0x518] sm:$0xff] %v647_v58  ;;  %v675_v58 = vadd.f32 %v1522_v19, %v401_v53  ;;  %v429_v53 = vld [vmem:[%s1487_s6 + $0x6d8] sm:$0xff] }
  0xce   : > { %904 = vst [vmem:[%s1524_s18 + $0x520] sm:$0xff] %v648_v60  ;;  %v676_v60 = vadd.f32 %v1499_v3, %v402_v55  ;;  %v430_v55 = vld [vmem:[%s1487_s6 + $0x6e0] sm:$0xff] }
  0xcf   : > { %905 = vst [vmem:[%s1524_s18 + $0x528] sm:$0xff] %v649_v62  ;;  %v677_v62 = vadd.f32 %v1501_v4, %v403_v57  ;;  %v431_v57 = vld [vmem:[%s1487_s6 + $0x6e8] sm:$0xff] }
  0xd0   : > { %906 = vst [vmem:[%s1524_s18 + $0x530] sm:$0xff] %v650_v0  ;;  %v678_v0 = vadd.f32 %v1504_v6, %v404_v59  ;;  %v432_v59 = vld [vmem:[%s1487_s6 + $0x6f0] sm:$0xff] }
  0xd1   : > { %907 = vst [vmem:[%s1524_s18 + $0x538] sm:$0xff] %v651_v2  ;;  %v679_v2 = vadd.f32 %v1507_v8, %v405_v61  ;;  %v433_v61 = vld [vmem:[%s1487_s6 + $0x6f8] sm:$0xff] }
  0xd2   : > { %908 = vst [vmem:[%s1524_s18 + $0x540] sm:$0xff] %v652_v7  ;;  %v680_v7 = vadd.f32 %v1510_v10, %v406_v63  ;;  %v434_v63 = vld [vmem:[%s1487_s6 + $0x700] sm:$0xff] }
  0xd3   : > { %909 = vst [vmem:[%s1524_s18 + $0x548] sm:$0xff] %v653_v12  ;;  %v681_v12 = vadd.f32 %v1512_v11, %v407_v1  ;;  %v435_v1 = vld [vmem:[%s1487_s6 + $0x708] sm:$0xff] }
  0xd4   : > { %910 = vst [vmem:[%s1524_s18 + $0x550] sm:$0xff] %v654_v14  ;;  %v682_v14 = vadd.f32 %v1518_v16, %v408_v5  ;;  %v436_v5 = vld [vmem:[%s1487_s6 + $0x710] sm:$0xff] }
  0xd5   : > { %911 = vst [vmem:[%s1524_s18 + $0x558] sm:$0xff] %v655_v17  ;;  %v683_v17 = vadd.f32 %v1522_v19, %v409_v9  ;;  %v437_v9 = vld [vmem:[%s1487_s6 + $0x718] sm:$0xff] }
  0xd6   : > { %912 = vst [vmem:[%s1524_s18 + $0x560] sm:$0xff] %v656_v20  ;;  %v684_v20 = vadd.f32 %v1499_v3, %v410_v13  ;;  %v438_v13 = vld [vmem:[%s1487_s6 + $0x720] sm:$0xff] }
  0xd7   : > { %913 = vst [vmem:[%s1524_s18 + $0x568] sm:$0xff] %v657_v22  ;;  %v685_v22 = vadd.f32 %v1501_v4, %v411_v15  ;;  %v439_v15 = vld [vmem:[%s1487_s6 + $0x728] sm:$0xff] }
  0xd8   : > { %914 = vst [vmem:[%s1524_s18 + $0x570] sm:$0xff] %v658_v24  ;;  %v686_v24 = vadd.f32 %v1504_v6, %v412_v18  ;;  %v440_v18 = vld [vmem:[%s1487_s6 + $0x730] sm:$0xff] }
  0xd9   : > { %915 = vst [vmem:[%s1524_s18 + $0x578] sm:$0xff] %v659_v26  ;;  %v687_v26 = vadd.f32 %v1507_v8, %v413_v21  ;;  %v441_v21 = vld [vmem:[%s1487_s6 + $0x738] sm:$0xff] }
  0xda   : > { %916 = vst [vmem:[%s1524_s18 + $0x580] sm:$0xff] %v660_v28  ;;  %v688_v28 = vadd.f32 %v1510_v10, %v414_v23  ;;  %v442_v23 = vld [vmem:[%s1487_s6 + $0x740] sm:$0xff] }
  0xdb   : > { %917 = vst [vmem:[%s1524_s18 + $0x588] sm:$0xff] %v661_v30  ;;  %v689_v30 = vadd.f32 %v1512_v11, %v415_v25  ;;  %v443_v25 = vld [vmem:[%s1487_s6 + $0x748] sm:$0xff] }
  0xdc   : > { %918 = vst [vmem:[%s1524_s18 + $0x590] sm:$0xff] %v662_v32  ;;  %v690_v32 = vadd.f32 %v1518_v16, %v416_v27  ;;  %v444_v27 = vld [vmem:[%s1487_s6 + $0x750] sm:$0xff] }
  0xdd   : > { %919 = vst [vmem:[%s1524_s18 + $0x598] sm:$0xff] %v663_v34  ;;  %v691_v34 = vadd.f32 %v1522_v19, %v417_v29  ;;  %v445_v29 = vld [vmem:[%s1487_s6 + $0x758] sm:$0xff] }
  0xde   : > { %920 = vst [vmem:[%s1524_s18 + $0x5a0] sm:$0xff] %v664_v36  ;;  %v692_v36 = vadd.f32 %v1499_v3, %v418_v31  ;;  %v446_v31 = vld [vmem:[%s1487_s6 + $0x760] sm:$0xff] }
  0xdf   : > { %921 = vst [vmem:[%s1524_s18 + $0x5a8] sm:$0xff] %v665_v38  ;;  %v693_v38 = vadd.f32 %v1501_v4, %v419_v33  ;;  %v447_v33 = vld [vmem:[%s1487_s6 + $0x768] sm:$0xff] }
  0xe0   : > { %922 = vst [vmem:[%s1524_s18 + $0x5b0] sm:$0xff] %v666_v40  ;;  %v694_v40 = vadd.f32 %v1504_v6, %v420_v35  ;;  %v448_v35 = vld [vmem:[%s1487_s6 + $0x770] sm:$0xff] }
  0xe1   : > { %923 = vst [vmem:[%s1524_s18 + $0x5b8] sm:$0xff] %v667_v42  ;;  %v695_v42 = vadd.f32 %v1507_v8, %v421_v37  ;;  %v449_v37 = vld [vmem:[%s1487_s6 + $0x778] sm:$0xff] }
  0xe2   : > { %924 = vst [vmem:[%s1524_s18 + $0x5c0] sm:$0xff] %v668_v44  ;;  %v696_v44 = vadd.f32 %v1510_v10, %v422_v39  ;;  %v450_v39 = vld [vmem:[%s1487_s6 + $0x780] sm:$0xff] }
  0xe3   : > { %925 = vst [vmem:[%s1524_s18 + $0x5c8] sm:$0xff] %v669_v46  ;;  %v697_v46 = vadd.f32 %v1512_v11, %v423_v41  ;;  %v451_v41 = vld [vmem:[%s1487_s6 + $0x788] sm:$0xff] }
  0xe4   : > { %926 = vst [vmem:[%s1524_s18 + $0x5d0] sm:$0xff] %v670_v48  ;;  %v698_v48 = vadd.f32 %v1518_v16, %v424_v43  ;;  %v452_v43 = vld [vmem:[%s1487_s6 + $0x790] sm:$0xff] }
  0xe5   : > { %927 = vst [vmem:[%s1524_s18 + $0x5d8] sm:$0xff] %v671_v50  ;;  %v699_v50 = vadd.f32 %v1522_v19, %v425_v45  ;;  %v453_v45 = vld [vmem:[%s1487_s6 + $0x798] sm:$0xff] }
  0xe6   : > { %928 = vst [vmem:[%s1524_s18 + $0x5e0] sm:$0xff] %v672_v52  ;;  %v700_v52 = vadd.f32 %v1499_v3, %v426_v47  ;;  %v454_v47 = vld [vmem:[%s1487_s6 + $0x7a0] sm:$0xff] }
  0xe7   : > { %929 = vst [vmem:[%s1524_s18 + $0x5e8] sm:$0xff] %v673_v54  ;;  %v701_v54 = vadd.f32 %v1501_v4, %v427_v49  ;;  %v455_v49 = vld [vmem:[%s1487_s6 + $0x7a8] sm:$0xff] }
  0xe8   : > { %930 = vst [vmem:[%s1524_s18 + $0x5f0] sm:$0xff] %v674_v56  ;;  %v702_v56 = vadd.f32 %v1504_v6, %v428_v51  ;;  %v456_v51 = vld [vmem:[%s1487_s6 + $0x7b0] sm:$0xff] }
  0xe9   : > { %931 = vst [vmem:[%s1524_s18 + $0x5f8] sm:$0xff] %v675_v58  ;;  %v703_v58 = vadd.f32 %v1507_v8, %v429_v53  ;;  %v457_v53 = vld [vmem:[%s1487_s6 + $0x7b8] sm:$0xff] }
  0xea   : > { %932 = vst [vmem:[%s1524_s18 + $0x600] sm:$0xff] %v676_v60  ;;  %v704_v60 = vadd.f32 %v1510_v10, %v430_v55  ;;  %v458_v55 = vld [vmem:[%s1487_s6 + $0x7c0] sm:$0xff] }
  0xeb   : > { %933 = vst [vmem:[%s1524_s18 + $0x608] sm:$0xff] %v677_v62  ;;  %v705_v62 = vadd.f32 %v1512_v11, %v431_v57  ;;  %v459_v57 = vld [vmem:[%s1487_s6 + $0x7c8] sm:$0xff] }
  0xec   : > { %934 = vst [vmem:[%s1524_s18 + $0x610] sm:$0xff] %v678_v0  ;;  %v706_v0 = vadd.f32 %v1518_v16, %v432_v59  ;;  %v460_v59 = vld [vmem:[%s1487_s6 + $0x7d0] sm:$0xff] }
  0xed   : > { %935 = vst [vmem:[%s1524_s18 + $0x618] sm:$0xff] %v679_v2  ;;  %v707_v2 = vadd.f32 %v1522_v19, %v433_v61  ;;  %v461_v61 = vld [vmem:[%s1487_s6 + $0x7d8] sm:$0xff] }
  0xee   : > { %936 = vst [vmem:[%s1524_s18 + $0x620] sm:$0xff] %v680_v7  ;;  %v708_v7 = vadd.f32 %v1499_v3, %v434_v63  ;;  %v462_v63 = vld [vmem:[%s1487_s6 + $0x7e0] sm:$0xff] }
  0xef   : > { %937 = vst [vmem:[%s1524_s18 + $0x628] sm:$0xff] %v681_v12  ;;  %v709_v12 = vadd.f32 %v1501_v4, %v435_v1  ;;  %v463_v1 = vld [vmem:[%s1487_s6 + $0x7e8] sm:$0xff] }
  0xf0   : > { %938 = vst [vmem:[%s1524_s18 + $0x630] sm:$0xff] %v682_v14  ;;  %v710_v14 = vadd.f32 %v1504_v6, %v436_v5  ;;  %v465_v5 = vld [vmem:[%s1487_s6 + $0x7f8] sm:$0xff] }
  0xf1   : > { %939 = vst [vmem:[%s1524_s18 + $0x638] sm:$0xff] %v683_v17  ;;  %v711_v17 = vadd.f32 %v1507_v8, %v437_v9 }
  0xf2   : > { %940 = vst [vmem:[%s1524_s18 + $0x640] sm:$0xff] %v684_v20  ;;  %v712_v20 = vadd.f32 %v1510_v10, %v438_v13 }
  0xf3   : > { %941 = vst [vmem:[%s1524_s18 + $0x648] sm:$0xff] %v685_v22  ;;  %v713_v22 = vadd.f32 %v1512_v11, %v439_v15 }
  0xf4   : > { %942 = vst [vmem:[%s1524_s18 + $0x650] sm:$0xff] %v686_v24  ;;  %v714_v24 = vadd.f32 %v1518_v16, %v440_v18 }
  0xf5   : > { %943 = vst [vmem:[%s1524_s18 + $0x658] sm:$0xff] %v687_v26  ;;  %v715_v26 = vadd.f32 %v1522_v19, %v441_v21 }
  0xf6   : > { %944 = vst [vmem:[%s1524_s18 + $0x660] sm:$0xff] %v688_v28  ;;  %v716_v28 = vadd.f32 %v1499_v3, %v442_v23 }
  0xf7   : > { %945 = vst [vmem:[%s1524_s18 + $0x668] sm:$0xff] %v689_v30  ;;  %v717_v30 = vadd.f32 %v1501_v4, %v443_v25 }
  0xf8   : > { %946 = vst [vmem:[%s1524_s18 + $0x670] sm:$0xff] %v690_v32  ;;  %v718_v32 = vadd.f32 %v1504_v6, %v444_v27 }
  0xf9   : > { %947 = vst [vmem:[%s1524_s18 + $0x678] sm:$0xff] %v691_v34  ;;  %v719_v34 = vadd.f32 %v1507_v8, %v445_v29 }
  0xfa   : > { %948 = vst [vmem:[%s1524_s18 + $0x680] sm:$0xff] %v692_v36  ;;  %v720_v36 = vadd.f32 %v1510_v10, %v446_v31 }
  0xfb   : > { %949 = vst [vmem:[%s1524_s18 + $0x688] sm:$0xff] %v693_v38  ;;  %v721_v38 = vadd.f32 %v1512_v11, %v447_v33 }
  0xfc   : > { %950 = vst [vmem:[%s1524_s18 + $0x690] sm:$0xff] %v694_v40  ;;  %v722_v40 = vadd.f32 %v1518_v16, %v448_v35 }
  0xfd   : > { %951 = vst [vmem:[%s1524_s18 + $0x698] sm:$0xff] %v695_v42  ;;  %v723_v42 = vadd.f32 %v1522_v19, %v449_v37 }
  0xfe   : > { %952 = vst [vmem:[%s1524_s18 + $0x6a0] sm:$0xff] %v696_v44  ;;  %v724_v44 = vadd.f32 %v1499_v3, %v450_v39 }
  0xff   : > { %953 = vst [vmem:[%s1524_s18 + $0x6a8] sm:$0xff] %v697_v46  ;;  %v725_v46 = vadd.f32 %v1501_v4, %v451_v41 }
 0x100   : > { %954 = vst [vmem:[%s1524_s18 + $0x6b0] sm:$0xff] %v698_v48  ;;  %v726_v48 = vadd.f32 %v1504_v6, %v452_v43 }
 0x101   : > { %955 = vst [vmem:[%s1524_s18 + $0x6b8] sm:$0xff] %v699_v50  ;;  %v727_v50 = vadd.f32 %v1507_v8, %v453_v45 }
 0x102   : > { %956 = vst [vmem:[%s1524_s18 + $0x6c0] sm:$0xff] %v700_v52  ;;  %v728_v52 = vadd.f32 %v1510_v10, %v454_v47 }
 0x103   : > { %957 = vst [vmem:[%s1524_s18 + $0x6c8] sm:$0xff] %v701_v54  ;;  %v729_v54 = vadd.f32 %v1512_v11, %v455_v49 }
 0x104   : > { %958 = vst [vmem:[%s1524_s18 + $0x6d0] sm:$0xff] %v702_v56  ;;  %v730_v56 = vadd.f32 %v1518_v16, %v456_v51 }
 0x105   : > { %959 = vst [vmem:[%s1524_s18 + $0x6d8] sm:$0xff] %v703_v58  ;;  %v731_v58 = vadd.f32 %v1522_v19, %v457_v53 }
 0x106   : > { %960 = vst [vmem:[%s1524_s18 + $0x6e0] sm:$0xff] %v704_v60  ;;  %v732_v60 = vadd.f32 %v1499_v3, %v458_v55  ;;  %v735_v3 = vadd.f32 %v1507_v8, %v461_v61  ;;  %v739_v8 = vadd.f32 %v1522_v19, %v465_v5 }
 0x107   : > { %961 = vst [vmem:[%s1524_s18 + $0x6e8] sm:$0xff] %v705_v62  ;;  %v733_v62 = vadd.f32 %v1501_v4, %v459_v57  ;;  %v736_v4 = vadd.f32 %v1510_v10, %v462_v63 }
 0x108   : > { %962 = vst [vmem:[%s1524_s18 + $0x6f0] sm:$0xff] %v706_v0  ;;  %v734_v0 = vadd.f32 %v1504_v6, %v460_v59  ;;  %v737_v6 = vadd.f32 %v1512_v11, %v463_v1 }
 0x109   : > { %963 = vst [vmem:[%s1524_s18 + $0x6f8] sm:$0xff] %v707_v2  ;;  %v464_v2 = vld [vmem:[%s1487_s6 + $0x7f0] sm:$0xff] }
 0x10a   : > { %964 = vst [vmem:[%s1524_s18 + $0x700] sm:$0xff] %v708_v7  ;;  %v738_v7 = vadd.f32 %v1518_v16, %v464_v2 }
 0x10b   : > { %965 = vst [vmem:[%s1524_s18 + $0x708] sm:$0xff] %v709_v12 }
 0x10c   : > { %966 = vst [vmem:[%s1524_s18 + $0x710] sm:$0xff] %v710_v14 }
 0x10d   : > { %967 = vst [vmem:[%s1524_s18 + $0x718] sm:$0xff] %v711_v17 }
 0x10e   : > { %968 = vst [vmem:[%s1524_s18 + $0x720] sm:$0xff] %v712_v20 }
 0x10f   : > { %969 = vst [vmem:[%s1524_s18 + $0x728] sm:$0xff] %v713_v22 }
 0x110   : > { %970 = vst [vmem:[%s1524_s18 + $0x730] sm:$0xff] %v714_v24 }
 0x111   : > { %971 = vst [vmem:[%s1524_s18 + $0x738] sm:$0xff] %v715_v26 }
 0x112   : > { %972 = vst [vmem:[%s1524_s18 + $0x740] sm:$0xff] %v716_v28 }
 0x113   : > { %973 = vst [vmem:[%s1524_s18 + $0x748] sm:$0xff] %v717_v30 }
 0x114   : > { %974 = vst [vmem:[%s1524_s18 + $0x750] sm:$0xff] %v718_v32 }
 0x115   : > { %975 = vst [vmem:[%s1524_s18 + $0x758] sm:$0xff] %v719_v34 }
 0x116   : > { %976 = vst [vmem:[%s1524_s18 + $0x760] sm:$0xff] %v720_v36 }
 0x117   : > { %977 = vst [vmem:[%s1524_s18 + $0x768] sm:$0xff] %v721_v38 }
 0x118   : > { %978 = vst [vmem:[%s1524_s18 + $0x770] sm:$0xff] %v722_v40 }
 0x119   : > { %979 = vst [vmem:[%s1524_s18 + $0x778] sm:$0xff] %v723_v42 }
 0x11a   : > { %980 = vst [vmem:[%s1524_s18 + $0x780] sm:$0xff] %v724_v44 }
 0x11b   : > { %981 = vst [vmem:[%s1524_s18 + $0x788] sm:$0xff] %v725_v46 }
 0x11c   : > { %982 = vst [vmem:[%s1524_s18 + $0x790] sm:$0xff] %v726_v48 }
 0x11d   : > { %983 = vst [vmem:[%s1524_s18 + $0x798] sm:$0xff] %v727_v50 }
 0x11e   : > { %984 = vst [vmem:[%s1524_s18 + $0x7a0] sm:$0xff] %v728_v52 }
 0x11f   : > { %985 = vst [vmem:[%s1524_s18 + $0x7a8] sm:$0xff] %v729_v54 }
 0x120   : > { %986 = vst [vmem:[%s1524_s18 + $0x7b0] sm:$0xff] %v730_v56 }
 0x121   : > { %987 = vst [vmem:[%s1524_s18 + $0x7b8] sm:$0xff] %v731_v58 }
 0x122   : > { %988 = vst [vmem:[%s1524_s18 + $0x7c0] sm:$0xff] %v732_v60 }
 0x123   : > { %989 = vst [vmem:[%s1524_s18 + $0x7c8] sm:$0xff] %v733_v62 }
 0x124   : > { %990 = vst [vmem:[%s1524_s18 + $0x7d0] sm:$0xff] %v734_v0 }
 0x125   : > { %991 = vst [vmem:[%s1524_s18 + $0x7d8] sm:$0xff] %v735_v3 }
 0x126   : > { %992 = vst [vmem:[%s1524_s18 + $0x7e0] sm:$0xff] %v736_v4 }
 0x127   : > { %993 = vst [vmem:[%s1524_s18 + $0x7e8] sm:$0xff] %v737_v6 }
 0x128   : > { %994 = vst [vmem:[%s1524_s18 + $0x7f0] sm:$0xff] %v738_v7 }
 0x129   : > { %995 = vst [vmem:[%s1524_s18 + $0x7f8] sm:$0xff] %v739_v8 }
 0x12a   : > { %1301 = shalt.err (!%p1298_p1)
}
 0x12b   : > { %s1365_s5 = smov 1024   ;;  %s1366_s4 = smov 64  }
 0x12c   : > { %1143 = dma.vmem_to_hbm [thread:$0]  (%p1434_p8), %s1013_s3, 32768, %s1015_s7, %s997_s8, %s1365_s5, %s1365_s5, %s1366_s4  }
 0x12d PF: > { %s1029_s17 = sand.u32 1, %s1340_s9   ;;  %p1154_p2 = pnand %p1118_p13, %p1438_p9 }
 0x12e   : > { %s1030_s6 = scalar_lea.sflag [#allocation4], %s1029_s17 }
 0x12f   : > { %p1155_p4 = pneg %p1154_p2 }
 0x131   : > { %1335 = dma.done.wait (%p1155_p4), %s1030_s6, 32768  }
 0x132   : > { %1337 = vsyncadd (%p1155_p4), %s1030_s6, 4294934528  ;;  %s19_s14 = sadd.s32 1, %s1360_s14   ;;  %s2332_s9 = smov %s1344_s10 }
 0x133   : > { %p16_p6 = scmp.ge.s32.totalorder %s19_s14, 4   ;;  %s2333_s10 = smov %s1348_s11 }
 0x134   : > { %s2334_s11 = smov %s1476_s23  ;;  %s2335_s12 = smov %s1356_s13 }
 0x135   : > { %s2336_s13 = smov %s2338_s30  ;;  %18 = sbr.rel (!%p16_p6) target bundleno = 7 (0x7), region = 78 }
 0x13a   :  { %1036 = vsyncpa [#allocation3], 1 }
 0x13b   :  { %1038 = vsyncpa [#allocation3 + $0x1], 1 }
 0x13c   :  { %1039 = vsyncpa [#allocation6], 1 }
 0x13d   :  { %1040 = vsyncpa [#allocation4], 1 }
 0x13e   :  { %1042 = vsyncpa [#allocation4 + $0x1], 1 }

</bundles_post_ra>
